<compile_context>
chip_gen: v7x
topology: tpu7x:2x2x1
jax: 0.10.0
libtpu: 0.0.40
codegen_flags: <defaults>
</compile_context>

<pallas_src>
import functools

import jax
import jax.numpy as jnp
from jax import lax
from jax.experimental import pallas as pl
from jax.experimental.pallas import tpu as pltpu


def _biattention_kernel(x_ref,         # (B, Ld, d)     bf16
                        mem_ref,       # (B, Lm, d)     bf16
                        in_dot_ref,    # (B, Ld, 1)     f32  (hoisted input_linear_1)
                        col_bias_ref,  # (B, 1, Lm)     f32  (hoisted memory_linear_1 + mask bias)
                        w_in2_ref,     # (d, hid)       bf16
                        b_in2_ref,     # (1, hid)       f32
                        w_mem2_ref,    # (d, hid)       bf16
                        b_mem2_ref,    # (1, hid)       f32
                        out_ref,       # (B, Ld, 4*hid) f32
                        mem_out_ref,   # (B, Lm, hid)   f32
                        *, inv_scale):
    B, Ld, d_in = x_ref.shape
    _, Lm, d_mem = mem_ref.shape
    hid = w_in2_ref.shape[1]

    # TODO(synk): F.dropout is an inference-time no-op (training=False); not implemented.

    x = x_ref[...]          # (B, Ld, d) bf16
    mem = mem_ref[...]      # (B, Lm, d) bf16

    # Cross logits: contract the shared feature dim of both operands directly
    # (trans-B path) so memory is shipped/buffered only once.  f32 accumulation.
    att = lax.dot_general(x, mem, (((2,), (2,)), ((0,), (0,))),
                          preferred_element_type=jnp.float32)        # (B, Ld, Lm)
    # 1/dot_scale fused with the two hoisted rank-1 bias adds (mask pre-folded).
    att = att * inv_scale + in_dot_ref[...] + col_bias_ref[...]

    # input_linear_2 / memory_linear_2 as 2-D bf16 MXU matmuls, f32 accumulate.
    x2 = (jnp.dot(x.reshape(B * Ld, d_in), w_in2_ref[...],
                  preferred_element_type=jnp.float32)
          + b_in2_ref[...]).reshape(B, Ld, hid)
    m2 = (jnp.dot(mem.reshape(B * Lm, d_mem), w_mem2_ref[...],
                  preferred_element_type=jnp.float32)
          + b_mem2_ref[...]).reshape(B, Lm, hid)

    # weight_one = softmax(att, dim=-1).  Reuse `att` for exp / probabilities so
    # only one (B, Ld, Lm) f32 temporary is live at a time.
    # TODO(synk): for very long Lm on v7x (64 MiB VMEM) tile Lm with an online
    # rescaled accumulator instead of materializing the full (B, Ld, Lm) tile.
    row_max = jnp.max(att, axis=-1, keepdims=True)                    # (B, Ld, 1)
    att = jnp.exp(att - row_max)
    att = att * pl.reciprocal(jnp.sum(att, axis=-1, keepdims=True), approx=True)
    # output_one = weight_one @ memory_2 — bf16 operands into the MXU, f32 acc.
    out1 = jnp.einsum('blm,bmh->blh', att.astype(jnp.bfloat16),
                      m2.astype(jnp.bfloat16),
                      preferred_element_type=jnp.float32)             # (B, Ld, hid)

    # weight_two = softmax(max_Lm(att), over Ld); output_two = weight_two @ input_2.
    col_max = jnp.max(row_max, axis=1, keepdims=True)                 # (B, 1, 1)
    q = jnp.exp(row_max - col_max)                                    # (B, Ld, 1)
    w2 = q * pl.reciprocal(jnp.sum(q, axis=1, keepdims=True), approx=True)
    # MXU contraction over Ld (instead of broadcast-mul + cross-sublane reduce).
    out2 = lax.dot_general(w2, x2, (((1,), (1,)), ((0,), (0,))),
                           preferred_element_type=jnp.float32)        # (B, 1, hid)

    # Lane-wise slice stores instead of a concatenate (no (Ld, 4*hid) temp).
    # TODO(synk): pad hid to a multiple of 128 for real configs so these stores
    # are unmasked, lane-dense vst.
    out_ref[:, :, 0:hid] = x2
    out_ref[:, :, hid:2 * hid] = out1
    out_ref[:, :, 2 * hid:3 * hid] = x2 * out1
    out_ref[:, :, 3 * hid:4 * hid] = out2 * out1
    mem_out_ref[...] = m2


def _estimate_vmem_bytes(B, Ld, Lm, d_in, d_mem, hid):
    """Rough per-grid-step VMEM footprint for batch block size B."""
    bf16, f32 = 2, 4
    # Streamed (double-buffered) input / output blocks.
    stream_in = 2 * (B * Ld * d_in * bf16 + B * Lm * d_mem * bf16
                     + B * Ld * 1 * f32 + B * 1 * Lm * f32)
    weights = (d_in * hid + d_mem * hid) * bf16 + 2 * hid * f32
    stream_out = 2 * (B * Ld * 4 * hid * f32 + B * Lm * hid * f32)
    # In-kernel temporaries: (Ld, Lm) logits (+ exp working copy) and the
    # x2 / m2 / out1 projection tiles.
    temps = 2 * B * Ld * Lm * f32 + (2 * B * Ld * hid + B * Lm * hid) * f32
    return stream_in + weights + stream_out + temps


def _pick_batch_block(N, Ld, Lm, d_in, d_mem, hid, vmem_budget):
    # Keep the grid >= 2 steps when possible so the ("parallel",) batch axis
    # can be split across v7x's two TensorCores (no-op on v5e/v6e).
    max_b = max(1, N // 2) if N >= 2 else 1
    best = 1
    for cand in range(1, max_b + 1):
        if N % cand == 0 and _estimate_vmem_bytes(
                cand, Ld, Lm, d_in, d_mem, hid) <= vmem_budget:
            best = cand
    return best


def biattention(x, mem, mask, params, dot_scale, *, batch_block=None,
                vmem_limit_bytes=48 * 1024 * 1024):
    """x: (N, Ld, d) f32; mem: (N, Lm, d) f32; mask: (N, Lm) 0/1 float."""
    N, Ld, d_in = x.shape
    _, Lm, d_mem = mem.shape
    assert d_in == d_mem, "cross bmm requires matching feature dims (as in the module)"
    w_in1, w_mem1, w_in2, b_in2, w_mem2, b_mem2 = params
    hid = w_in2.shape[1]

    if batch_block is None:
        # Budget well under the vmem limit, which itself sits under v7x's
        # 64 MiB physical VMEM per core; v5e/v6e (128 MiB) simply get slack.
        batch_block = _pick_batch_block(N, Ld, Lm, d_in, d_mem, hid,
                                        int(0.6 * vmem_limit_bytes))
    assert N % batch_block == 0, "batch_block must divide N"
    B = batch_block

    inv_scale = float(1.0 / float(dot_scale))

    # --- cheap wrapper-side (XLA) prep ---------------------------------------
    # Hoisted degenerate out_features=1 linears (exact, f32) + folded mask bias.
    input_dot = (x @ w_in1).astype(jnp.float32)                        # (N, Ld, 1)
    memory_dot = jnp.einsum('nmd,od->nom', mem, w_mem1)                # (N, 1, Lm)
    mask_bias = (mask[:, None, :].astype(jnp.float32) - 1.0) * 1e30    # 0 / -1e30
    col_bias = (memory_dot + mask_bias).astype(jnp.float32)            # (N, 1, Lm)

    # bf16 MXU operands (f32 accumulation happens inside the kernel).
    x_bf = x.astype(jnp.bfloat16)
    mem_bf = mem.astype(jnp.bfloat16)
    w_in2_bf = w_in2.astype(jnp.bfloat16)
    w_mem2_bf = w_mem2.astype(jnp.bfloat16)
    b_in2_2d = b_in2.reshape(1, hid).astype(jnp.float32)
    b_mem2_2d = b_mem2.reshape(1, hid).astype(jnp.float32)

    kernel = functools.partial(_biattention_kernel, inv_scale=inv_scale)
    out_shape = (jax.ShapeDtypeStruct((N, Ld, 4 * hid), jnp.float32),
                 jax.ShapeDtypeStruct((N, Lm, hid), jnp.float32))

    def _run(single_buffer_weights):
        wkw = dict(pipeline_mode=pl.Buffered(1)) if single_buffer_weights else {}
        grid_spec = pltpu.PrefetchScalarGridSpec(
            num_scalar_prefetch=0,
            grid=(N // B,),
            in_specs=[
                pl.BlockSpec((B, Ld, d_in), lambda b: (b, 0, 0)),
                pl.BlockSpec((B, Lm, d_mem), lambda b: (b, 0, 0)),
                pl.BlockSpec((B, Ld, 1), lambda b: (b, 0, 0)),
                pl.BlockSpec((B, 1, Lm), lambda b: (b, 0, 0)),
                pl.BlockSpec((d_in, hid), lambda b: (0, 0), **wkw),
                pl.BlockSpec((1, hid), lambda b: (0, 0), **wkw),
                pl.BlockSpec((d_mem, hid), lambda b: (0, 0), **wkw),
                pl.BlockSpec((1, hid), lambda b: (0, 0), **wkw),
            ],
            out_specs=[
                pl.BlockSpec((B, Ld, 4 * hid), lambda b: (b, 0, 0)),
                pl.BlockSpec((B, Lm, hid), lambda b: (b, 0, 0)),
            ],
        )
        res = pl.pallas_call(
            kernel,
            out_shape=out_shape,
            grid_spec=grid_spec,
            compiler_params=pltpu.CompilerParams(
                dimension_semantics=("parallel",),
                vmem_limit_bytes=vmem_limit_bytes),
        )(x_bf, mem_bf, input_dot, col_bias,
          w_in2_bf, b_in2_2d, w_mem2_bf, b_mem2_2d)
        jax.block_until_ready(res)
        return res

    try:
        out, mem_out = _run(True)
    except Exception:
        # Some JAX builds reject pipeline_mode=pl.Buffered(1) on the outer
        # pallas_call BlockSpecs; fall back to default double buffering.
        out, mem_out = _run(False)
    return out, mem_out


def biattention_reference(x, mem, mask, params, dot_scale):
    w_in1, w_mem1, w_in2, b_in2, w_mem2, b_mem2 = params
    input_dot = x @ w_in1                                       # (N, Ld, 1)
    memory_dot = jnp.einsum('nld,od->nol', mem, w_mem1)         # (N, 1, Lm)
    cross = jnp.einsum('nid,njd->nij', x, mem) / dot_scale      # (N, Ld, Lm)
    att = input_dot + memory_dot + cross - 1e30 * (1.0 - mask[:, None, :])
    x2 = x @ w_in2 + b_in2
    m2 = mem @ w_mem2 + b_mem2
    w1 = jax.nn.softmax(att, axis=-1)
    out1 = jnp.einsum('nij,njh->nih', w1, m2)
    w2 = jax.nn.softmax(jnp.max(att, axis=-1), axis=-1)         # (N, Ld)
    out2 = jnp.einsum('ni,nih->nh', w2, x2)[:, None, :]         # (N, 1, hid)
    out = jnp.concatenate([x2, out1, x2 * out1, out2 * out1], axis=-1)
    return out, m2


if __name__ == "__main__":
    # Small, MXU-friendly sizes consistent with the module's forward.
    N, Ld, Lm = 2, 16, 8
    d_in = d_mem = 32
    hid = 32
    dot_scale = float(jnp.sqrt(jnp.float32(d_in)))

    key = jax.random.PRNGKey(0)
    keys = jax.random.split(key, 8)
    x = jax.random.normal(keys[0], (N, Ld, d_in), jnp.float32)
    mem = jax.random.normal(keys[1], (N, Lm, d_mem), jnp.float32)

    # query mask: first `length` positions valid per batch element
    lengths = jnp.array([Lm, Lm - 3], jnp.int32)
    mask = (jnp.arange(Lm)[None, :] < lengths[:, None]).astype(jnp.float32)

    # Deterministic synthetic parameters (shapes follow the nn.Linear layers).
    scale = 0.05
    w_in1 = scale * jax.random.normal(keys[2], (d_in, 1), jnp.float32)      # input_linear_1.weight^T
    w_mem1 = scale * jax.random.normal(keys[3], (1, d_mem), jnp.float32)    # memory_linear_1.weight
    w_in2 = scale * jax.random.normal(keys[4], (d_in, hid), jnp.float32)    # input_linear_2.weight^T
    b_in2 = scale * jax.random.normal(keys[5], (hid,), jnp.float32)
    w_mem2 = scale * jax.random.normal(keys[6], (d_mem, hid), jnp.float32)  # memory_linear_2.weight^T
    b_mem2 = scale * jax.random.normal(keys[7], (hid,), jnp.float32)
    params = (w_in1, w_mem1, w_in2, b_in2, w_mem2, b_mem2)

    out, mem_out = biattention(x, mem, mask, params, dot_scale)
    jax.block_until_ready((out, mem_out))

    out_ref, mem_out_ref = biattention_reference(x, mem, mask, params, dot_scale)
    assert out.shape == (N, Ld, 4 * hid)
    assert mem_out.shape == (N, Lm, hid)
    # Tolerance relaxed vs 1e-5 because (a) the matmul operands are bf16
    # (f32-accumulated) and (b) the softmax denominators use the EUP approximate
    # reciprocal (pl.reciprocal(..., approx=True)).
    assert jnp.allclose(out, out_ref, rtol=3e-2, atol=3e-2), (
        float(jnp.max(jnp.abs(out - out_ref))))
    assert jnp.allclose(mem_out, mem_out_ref, rtol=3e-2, atol=3e-2), (
        float(jnp.max(jnp.abs(mem_out - mem_out_ref))))

    print("KERNEL_OK")
</pallas_src>

<mosaic_0001>
module attributes {stable_mosaic.version = 11 : i64} {
  func.func @_biattention_kernel(%arg0: i32, %arg1: memref<1x16x32xbf16, #tpu.memory_space<vmem>>, %arg2: memref<1x8x32xbf16, #tpu.memory_space<vmem>>, %arg3: memref<1x16x1xf32, #tpu.memory_space<vmem>>, %arg4: memref<1x1x8xf32, #tpu.memory_space<vmem>>, %arg5: memref<32x32xbf16, #tpu.memory_space<vmem>>, %arg6: memref<1x32xf32, #tpu.memory_space<vmem>>, %arg7: memref<32x32xbf16, #tpu.memory_space<vmem>>, %arg8: memref<1x32xf32, #tpu.memory_space<vmem>>, %arg9: memref<1x16x128xf32, #tpu.memory_space<vmem>>, %arg10: memref<1x8x32xf32, #tpu.memory_space<vmem>>) attributes {dimension_semantics = [#tpu.dimension_semantics<parallel>], iteration_bounds = array<i64: 2>, scalar_prefetch = 0 : i64, scratch_operands = 0 : i64, tpu.core_type = #tpu.core_type<tc>, window_params = [{transform_indices = @transform_0, window_bounds = array<i64: 1, 16, 32>}, {transform_indices = @transform_1, window_bounds = array<i64: 1, 8, 32>}, {transform_indices = @transform_2, window_bounds = array<i64: 1, 16, 1>}, {transform_indices = @transform_3, window_bounds = array<i64: 1, 1, 8>}, {pipeline_mode = #tpu.pipeline_mode<synchronous>, transform_indices = @transform_4, window_bounds = array<i64: 32, 32>}, {pipeline_mode = #tpu.pipeline_mode<synchronous>, transform_indices = @transform_5, window_bounds = array<i64: 1, 32>}, {pipeline_mode = #tpu.pipeline_mode<synchronous>, transform_indices = @transform_6, window_bounds = array<i64: 32, 32>}, {pipeline_mode = #tpu.pipeline_mode<synchronous>, transform_indices = @transform_7, window_bounds = array<i64: 1, 32>}, {transform_indices = @transform_8, window_bounds = array<i64: 1, 16, 128>}, {transform_indices = @transform_9, window_bounds = array<i64: 1, 8, 32>}]} {
    %c0 = arith.constant 0 : index
    %c0_0 = arith.constant 0 : index
    %c0_1 = arith.constant 0 : index
    %0 = vector.load %arg1[%c0, %c0_0, %c0_1] : memref<1x16x32xbf16, #tpu.memory_space<vmem>>, vector<1x16x32xbf16>
    %c0_2 = arith.constant 0 : index
    %c0_3 = arith.constant 0 : index
    %c0_4 = arith.constant 0 : index
    %1 = vector.load %arg2[%c0_2, %c0_3, %c0_4] : memref<1x8x32xbf16, #tpu.memory_space<vmem>>, vector<1x8x32xbf16>
    %cst = arith.constant dense<0.000000e+00> : vector<1x16x8xf32>
    %2 = tpu.matmul %0, %1, %cst {dimension_numbers = #tpu.dot_dimension_numbers<[2], [2], [1], [1], [0, 0, 0, 1, 1, 1], [0], [0]>} : vector<1x16x32xbf16>, vector<1x8x32xbf16>, vector<1x16x8xf32> -> vector<1x16x8xf32>
    %cst_5 = arith.constant 0.176776692 : f32
    %3 = vector.broadcast %cst_5 : f32 to vector<1x16x8xf32>
    %4 = arith.mulf %2, %3 : vector<1x16x8xf32>
    %c0_6 = arith.constant 0 : index
    %c0_7 = arith.constant 0 : index
    %c0_8 = arith.constant 0 : index
    %5 = vector.load %arg3[%c0_6, %c0_7, %c0_8] : memref<1x16x1xf32, #tpu.memory_space<vmem>>, vector<1x16x1xf32>
    %6 = vector.broadcast %5 : vector<1x16x1xf32> to vector<1x16x8xf32>
    %7 = arith.addf %4, %6 : vector<1x16x8xf32>
    %c0_9 = arith.constant 0 : index
    %c0_10 = arith.constant 0 : index
    %c0_11 = arith.constant 0 : index
    %8 = vector.load %arg4[%c0_9, %c0_10, %c0_11] : memref<1x1x8xf32, #tpu.memory_space<vmem>>, vector<1x1x8xf32>
    %9 = vector.broadcast %8 : vector<1x1x8xf32> to vector<1x16x8xf32>
    %10 = arith.addf %7, %9 : vector<1x16x8xf32>
    %11 = vector.shape_cast %0 : vector<1x16x32xbf16> to vector<16x32xbf16>
    %c0_12 = arith.constant 0 : index
    %c0_13 = arith.constant 0 : index
    %12 = vector.load %arg5[%c0_12, %c0_13] : memref<32x32xbf16, #tpu.memory_space<vmem>>, vector<32x32xbf16>
    %cst_14 = arith.constant dense<0.000000e+00> : vector<16x32xf32>
    %13 = tpu.matmul %11, %12, %cst_14 {dimension_numbers = #tpu.dot_dimension_numbers<[1], [0], [0], [1], [0, 0, 1, 1], [], []>} : vector<16x32xbf16>, vector<32x32xbf16>, vector<16x32xf32> -> vector<16x32xf32>
    %c0_15 = arith.constant 0 : index
    %c0_16 = arith.constant 0 : index
    %14 = vector.load %arg6[%c0_15, %c0_16] : memref<1x32xf32, #tpu.memory_space<vmem>>, vector<1x32xf32>
    %15 = vector.broadcast %14 : vector<1x32xf32> to vector<16x32xf32>
    %16 = arith.addf %13, %15 : vector<16x32xf32>
    %17 = vector.shape_cast %16 : vector<16x32xf32> to vector<1x16x32xf32>
    %18 = vector.shape_cast %1 : vector<1x8x32xbf16> to vector<8x32xbf16>
    %c0_17 = arith.constant 0 : index
    %c0_18 = arith.constant 0 : index
    %19 = vector.load %arg7[%c0_17, %c0_18] : memref<32x32xbf16, #tpu.memory_space<vmem>>, vector<32x32xbf16>
    %cst_19 = arith.constant dense<0.000000e+00> : vector<8x32xf32>
    %20 = tpu.matmul %18, %19, %cst_19 {dimension_numbers = #tpu.dot_dimension_numbers<[1], [0], [0], [1], [0, 0, 1, 1], [], []>} : vector<8x32xbf16>, vector<32x32xbf16>, vector<8x32xf32> -> vector<8x32xf32>
    %c0_20 = arith.constant 0 : index
    %c0_21 = arith.constant 0 : index
    %21 = vector.load %arg8[%c0_20, %c0_21] : memref<1x32xf32, #tpu.memory_space<vmem>>, vector<1x32xf32>
    %22 = vector.broadcast %21 : vector<1x32xf32> to vector<8x32xf32>
    %23 = arith.addf %20, %22 : vector<8x32xf32>
    %24 = vector.shape_cast %23 : vector<8x32xf32> to vector<1x8x32xf32>
    %cst_22 = arith.constant dense<0xFF800000> : vector<1x16xf32>
    %25 = vector.multi_reduction <maximumf>, %10, %cst_22 [2] : vector<1x16x8xf32> to vector<1x16xf32>
    %26 = vector.shape_cast %25 : vector<1x16xf32> to vector<1x16x1xf32>
    %27 = vector.broadcast %26 : vector<1x16x1xf32> to vector<1x16x8xf32>
    %28 = arith.subf %10, %27 : vector<1x16x8xf32>
    %29 = math.exp %28 : vector<1x16x8xf32>
    %cst_23 = arith.constant dense<0.000000e+00> : vector<1x16xf32>
    %30 = vector.multi_reduction <add>, %29, %cst_23 [2] : vector<1x16x8xf32> to vector<1x16xf32>
    %31 = vector.shape_cast %30 : vector<1x16xf32> to vector<1x16x1xf32>
    %32 = tpu.reciprocal %31 {approx = true} : vector<1x16x1xf32> -> vector<1x16x1xf32>
    %33 = vector.broadcast %32 : vector<1x16x1xf32> to vector<1x16x8xf32>
    %34 = arith.mulf %29, %33 : vector<1x16x8xf32>
    %35 = arith.truncf %34 : vector<1x16x8xf32> to vector<1x16x8xbf16>
    %36 = arith.truncf %24 : vector<1x8x32xf32> to vector<1x8x32xbf16>
    "tpu.trace_start"() <{level = 10 : i32, message = "blm,bmh->blh"}> : () -> ()
    %cst_24 = arith.constant dense<0.000000e+00> : vector<1x16x32xf32>
    %37 = tpu.matmul %35, %36, %cst_24 {dimension_numbers = #tpu.dot_dimension_numbers<[2], [1], [1], [2], [0, 0, 0, 1, 1, 2], [0], [0]>} : vector<1x16x8xbf16>, vector<1x8x32xbf16>, vector<1x16x32xf32> -> vector<1x16x32xf32>
    "tpu.trace_stop"() : () -> ()
    %cst_25 = arith.constant dense<0xFF800000> : vector<1x1xf32>
    %38 = vector.multi_reduction <maximumf>, %26, %cst_25 [1] : vector<1x16x1xf32> to vector<1x1xf32>
    %39 = vector.shape_cast %38 : vector<1x1xf32> to vector<1x1x1xf32>
    %40 = vector.broadcast %39 : vector<1x1x1xf32> to vector<1x16x1xf32>
    %41 = arith.subf %26, %40 : vector<1x16x1xf32>
    %42 = math.exp %41 : vector<1x16x1xf32>
    %cst_26 = arith.constant dense<0.000000e+00> : vector<1x1xf32>
    %43 = vector.multi_reduction <add>, %42, %cst_26 [1] : vector<1x16x1xf32> to vector<1x1xf32>
    %44 = vector.shape_cast %43 : vector<1x1xf32> to vector<1x1x1xf32>
    %45 = tpu.reciprocal %44 {approx = true} : vector<1x1x1xf32> -> vector<1x1x1xf32>
    %46 = vector.broadcast %45 : vector<1x1x1xf32> to vector<1x16x1xf32>
    %47 = arith.mulf %42, %46 : vector<1x16x1xf32>
    %cst_27 = arith.constant dense<0.000000e+00> : vector<1x1x32xf32>
    %48 = tpu.matmul %47, %17, %cst_27 {dimension_numbers = #tpu.dot_dimension_numbers<[1], [1], [2], [2], [0, 0, 0, 2, 1, 2], [0], [0]>} : vector<1x16x1xf32>, vector<1x16x32xf32>, vector<1x1x32xf32> -> vector<1x1x32xf32>
    %c0_28 = arith.constant 0 : index
    %c0_29 = arith.constant 0 : index
    %c0_30 = arith.constant 0 : index
    %49 = vector.load %arg9[%c0_28, %c0_29, %c0_30] : memref<1x16x128xf32, #tpu.memory_space<vmem>>, vector<1x16x32xf32>
    tpu.vector_store %arg9[%c0_28, %c0_29, %c0_30], %17 {strides = array<i32>} : memref<1x16x128xf32, #tpu.memory_space<vmem>>, vector<1x16x32xf32>,
    %c0_31 = arith.constant 0 : index
    %c0_32 = arith.constant 0 : index
    %c32 = arith.constant 32 : index
    %50 = vector.load %arg9[%c0_31, %c0_32, %c32] : memref<1x16x128xf32, #tpu.memory_space<vmem>>, vector<1x16x32xf32>
    tpu.vector_store %arg9[%c0_31, %c0_32, %c32], %37 {strides = array<i32>} : memref<1x16x128xf32, #tpu.memory_space<vmem>>, vector<1x16x32xf32>,
    %51 = arith.mulf %17, %37 : vector<1x16x32xf32>
    %c0_33 = arith.constant 0 : index
    %c0_34 = arith.constant 0 : index
    %c64 = arith.constant 64 : index
    %52 = vector.load %arg9[%c0_33, %c0_34, %c64] : memref<1x16x128xf32, #tpu.memory_space<vmem>>, vector<1x16x32xf32>
    tpu.vector_store %arg9[%c0_33, %c0_34, %c64], %51 {strides = array<i32>} : memref<1x16x128xf32, #tpu.memory_space<vmem>>, vector<1x16x32xf32>,
    %53 = vector.broadcast %48 : vector<1x1x32xf32> to vector<1x16x32xf32>
    %54 = arith.mulf %53, %37 : vector<1x16x32xf32>
    %c0_35 = arith.constant 0 : index
    %c0_36 = arith.constant 0 : index
    %c96 = arith.constant 96 : index
    %55 = vector.load %arg9[%c0_35, %c0_36, %c96] : memref<1x16x128xf32, #tpu.memory_space<vmem>>, vector<1x16x32xf32>
    tpu.vector_store %arg9[%c0_35, %c0_36, %c96], %54 {strides = array<i32>} : memref<1x16x128xf32, #tpu.memory_space<vmem>>, vector<1x16x32xf32>,
    %c0_37 = arith.constant 0 : index
    %c0_38 = arith.constant 0 : index
    %c0_39 = arith.constant 0 : index
    %56 = vector.load %arg10[%c0_37, %c0_38, %c0_39] : memref<1x8x32xf32, #tpu.memory_space<vmem>>, vector<1x8x32xf32>
    tpu.vector_store %arg10[%c0_37, %c0_38, %c0_39], %24 {strides = array<i32>} : memref<1x8x32xf32, #tpu.memory_space<vmem>>, vector<1x8x32xf32>,
    return
  }
  func.func @transform_0(%arg0: i32) -> (i32, i32, i32) {
    %c0_i32 = arith.constant 0 : i32
    %c0_i32_0 = arith.constant 0 : i32
    %c0_i32_1 = arith.constant 0 : i32
    return %arg0, %c0_i32, %c0_i32_0 : i32, i32, i32
  }
  func.func @transform_1(%arg0: i32) -> (i32, i32, i32) {
    %c0_i32 = arith.constant 0 : i32
    %c0_i32_0 = arith.constant 0 : i32
    %c0_i32_1 = arith.constant 0 : i32
    return %arg0, %c0_i32, %c0_i32_0 : i32, i32, i32
  }
  func.func @transform_2(%arg0: i32) -> (i32, i32, i32) {
    %c0_i32 = arith.constant 0 : i32
    %c0_i32_0 = arith.constant 0 : i32
    %c0_i32_1 = arith.constant 0 : i32
    return %arg0, %c0_i32, %c0_i32_0 : i32, i32, i32
  }
  func.func @transform_3(%arg0: i32) -> (i32, i32, i32) {
    %c0_i32 = arith.constant 0 : i32
    %c0_i32_0 = arith.constant 0 : i32
    %c0_i32_1 = arith.constant 0 : i32
    return %arg0, %c0_i32, %c0_i32_0 : i32, i32, i32
  }
  func.func @transform_4(%arg0: i32) -> (i32, i32) {
    %c0_i32 = arith.constant 0 : i32
    %c0_i32_0 = arith.constant 0 : i32
    %c0_i32_1 = arith.constant 0 : i32
    return %c0_i32, %c0_i32_0 : i32, i32
  }
  func.func @transform_5(%arg0: i32) -> (i32, i32) {
    %c0_i32 = arith.constant 0 : i32
    %c0_i32_0 = arith.constant 0 : i32
    %c0_i32_1 = arith.constant 0 : i32
    return %c0_i32, %c0_i32_0 : i32, i32
  }
  func.func @transform_6(%arg0: i32) -> (i32, i32) {
    %c0_i32 = arith.constant 0 : i32
    %c0_i32_0 = arith.constant 0 : i32
    %c0_i32_1 = arith.constant 0 : i32
    return %c0_i32, %c0_i32_0 : i32, i32
  }
  func.func @transform_7(%arg0: i32) -> (i32, i32) {
    %c0_i32 = arith.constant 0 : i32
    %c0_i32_0 = arith.constant 0 : i32
    %c0_i32_1 = arith.constant 0 : i32
    return %c0_i32, %c0_i32_0 : i32, i32
  }
  func.func @transform_8(%arg0: i32) -> (i32, i32, i32) {
    %c0_i32 = arith.constant 0 : i32
    %c0_i32_0 = arith.constant 0 : i32
    %c0_i32_1 = arith.constant 0 : i32
    return %arg0, %c0_i32, %c0_i32_0 : i32, i32, i32
  }
  func.func @transform_9(%arg0: i32) -> (i32, i32, i32) {
    %c0_i32 = arith.constant 0 : i32
    %c0_i32_0 = arith.constant 0 : i32
    %c0_i32_1 = arith.constant 0 : i32
    return %arg0, %c0_i32, %c0_i32_0 : i32, i32, i32
  }
}

module attributes {stable_mosaic.version = 11 : i64} {
  func.func @_biattention_kernel(%arg0: i32, %arg1: memref<1x16x32xbf16, #tpu.memory_space<vmem>>, %arg2: memref<1x8x32xbf16, #tpu.memory_space<vmem>>, %arg3: memref<1x16x1xf32, #tpu.memory_space<vmem>>, %arg4: memref<1x1x8xf32, #tpu.memory_space<vmem>>, %arg5: memref<32x32xbf16, #tpu.memory_space<vmem>>, %arg6: memref<1x32xf32, #tpu.memory_space<vmem>>, %arg7: memref<32x32xbf16, #tpu.memory_space<vmem>>, %arg8: memref<1x32xf32, #tpu.memory_space<vmem>>, %arg9: memref<1x16x128xf32, #tpu.memory_space<vmem>>, %arg10: memref<1x8x32xf32, #tpu.memory_space<vmem>>) attributes {dimension_semantics = [#tpu.dimension_semantics<parallel>], iteration_bounds = array<i64: 2>, scalar_prefetch = 0 : i64, scratch_operands = 0 : i64, tpu.core_type = #tpu.core_type<tc>, window_params = [{transform_indices = @transform_0, window_bounds = array<i64: 1, 16, 32>}, {transform_indices = @transform_1, window_bounds = array<i64: 1, 8, 32>}, {transform_indices = @transform_2, window_bounds = array<i64: 1, 16, 1>}, {transform_indices = @transform_3, window_bounds = array<i64: 1, 1, 8>}, {pipeline_mode = #tpu.pipeline_mode<synchronous>, transform_indices = @transform_4, window_bounds = array<i64: 32, 32>}, {pipeline_mode = #tpu.pipeline_mode<synchronous>, transform_indices = @transform_5, window_bounds = array<i64: 1, 32>}, {pipeline_mode = #tpu.pipeline_mode<synchronous>, transform_indices = @transform_6, window_bounds = array<i64: 32, 32>}, {pipeline_mode = #tpu.pipeline_mode<synchronous>, transform_indices = @transform_7, window_bounds = array<i64: 1, 32>}, {transform_indices = @transform_8, window_bounds = array<i64: 1, 16, 128>}, {transform_indices = @transform_9, window_bounds = array<i64: 1, 8, 32>}]} {
    %c0 = arith.constant 0 : index
    %c0_0 = arith.constant 0 : index
    %c0_1 = arith.constant 0 : index
    %0 = vector.load %arg1[%c0, %c0_0, %c0_1] : memref<1x16x32xbf16, #tpu.memory_space<vmem>>, vector<1x16x32xbf16>
    %c0_2 = arith.constant 0 : index
    %c0_3 = arith.constant 0 : index
    %c0_4 = arith.constant 0 : index
    %1 = vector.load %arg2[%c0_2, %c0_3, %c0_4] : memref<1x8x32xbf16, #tpu.memory_space<vmem>>, vector<1x8x32xbf16>
    %cst = arith.constant dense<0.000000e+00> : vector<1x16x8xf32>
    %2 = tpu.matmul %0, %1, %cst {dimension_numbers = #tpu.dot_dimension_numbers<[2], [2], [1], [1], [0, 0, 0, 1, 1, 1], [0], [0]>} : vector<1x16x32xbf16>, vector<1x8x32xbf16>, vector<1x16x8xf32> -> vector<1x16x8xf32>
    %cst_5 = arith.constant 0.176776692 : f32
    %3 = vector.broadcast %cst_5 : f32 to vector<1x16x8xf32>
    %4 = arith.mulf %2, %3 : vector<1x16x8xf32>
    %c0_6 = arith.constant 0 : index
    %c0_7 = arith.constant 0 : index
    %c0_8 = arith.constant 0 : index
    %5 = vector.load %arg3[%c0_6, %c0_7, %c0_8] : memref<1x16x1xf32, #tpu.memory_space<vmem>>, vector<1x16x1xf32>
    %6 = vector.broadcast %5 : vector<1x16x1xf32> to vector<1x16x8xf32>
    %7 = arith.addf %4, %6 : vector<1x16x8xf32>
    %c0_9 = arith.constant 0 : index
    %c0_10 = arith.constant 0 : index
    %c0_11 = arith.constant 0 : index
    %8 = vector.load %arg4[%c0_9, %c0_10, %c0_11] : memref<1x1x8xf32, #tpu.memory_space<vmem>>, vector<1x1x8xf32>
    %9 = vector.broadcast %8 : vector<1x1x8xf32> to vector<1x16x8xf32>
    %10 = arith.addf %7, %9 : vector<1x16x8xf32>
    %11 = vector.shape_cast %0 : vector<1x16x32xbf16> to vector<16x32xbf16>
    %c0_12 = arith.constant 0 : index
    %c0_13 = arith.constant 0 : index
    %12 = vector.load %arg5[%c0_12, %c0_13] : memref<32x32xbf16, #tpu.memory_space<vmem>>, vector<32x32xbf16>
    %cst_14 = arith.constant dense<0.000000e+00> : vector<16x32xf32>
    %13 = tpu.matmul %11, %12, %cst_14 {dimension_numbers = #tpu.dot_dimension_numbers<[1], [0], [0], [1], [0, 0, 1, 1], [], []>} : vector<16x32xbf16>, vector<32x32xbf16>, vector<16x32xf32> -> vector<16x32xf32>
    %c0_15 = arith.constant 0 : index
    %c0_16 = arith.constant 0 : index
    %14 = vector.load %arg6[%c0_15, %c0_16] : memref<1x32xf32, #tpu.memory_space<vmem>>, vector<1x32xf32>
    %15 = vector.broadcast %14 : vector<1x32xf32> to vector<16x32xf32>
    %16 = arith.addf %13, %15 : vector<16x32xf32>
    %17 = vector.shape_cast %16 : vector<16x32xf32> to vector<1x16x32xf32>
    %18 = vector.shape_cast %1 : vector<1x8x32xbf16> to vector<8x32xbf16>
    %c0_17 = arith.constant 0 : index
    %c0_18 = arith.constant 0 : index
    %19 = vector.load %arg7[%c0_17, %c0_18] : memref<32x32xbf16, #tpu.memory_space<vmem>>, vector<32x32xbf16>
    %cst_19 = arith.constant dense<0.000000e+00> : vector<8x32xf32>
    %20 = tpu.matmul %18, %19, %cst_19 {dimension_numbers = #tpu.dot_dimension_numbers<[1], [0], [0], [1], [0, 0, 1, 1], [], []>} : vector<8x32xbf16>, vector<32x32xbf16>, vector<8x32xf32> -> vector<8x32xf32>
    %c0_20 = arith.constant 0 : index
    %c0_21 = arith.constant 0 : index
    %21 = vector.load %arg8[%c0_20, %c0_21] : memref<1x32xf32, #tpu.memory_space<vmem>>, vector<1x32xf32>
    %22 = vector.broadcast %21 : vector<1x32xf32> to vector<8x32xf32>
    %23 = arith.addf %20, %22 : vector<8x32xf32>
    %24 = vector.shape_cast %23 : vector<8x32xf32> to vector<1x8x32xf32>
    %cst_22 = arith.constant dense<0xFF800000> : vector<1x16xf32>
    %25 = vector.multi_reduction <maximumf>, %10, %cst_22 [2] : vector<1x16x8xf32> to vector<1x16xf32>
    %26 = vector.shape_cast %25 : vector<1x16xf32> to vector<1x16x1xf32>
    %27 = vector.broadcast %26 : vector<1x16x1xf32> to vector<1x16x8xf32>
    %28 = arith.subf %10, %27 : vector<1x16x8xf32>
    %29 = math.exp %28 : vector<1x16x8xf32>
    %cst_23 = arith.constant dense<0.000000e+00> : vector<1x16xf32>
    %30 = vector.multi_reduction <add>, %29, %cst_23 [2] : vector<1x16x8xf32> to vector<1x16xf32>
    %31 = vector.shape_cast %30 : vector<1x16xf32> to vector<1x16x1xf32>
    %32 = tpu.reciprocal %31 {approx = true} : vector<1x16x1xf32> -> vector<1x16x1xf32>
    %33 = vector.broadcast %32 : vector<1x16x1xf32> to vector<1x16x8xf32>
    %34 = arith.mulf %29, %33 : vector<1x16x8xf32>
    %35 = arith.truncf %34 : vector<1x16x8xf32> to vector<1x16x8xbf16>
    %36 = arith.truncf %24 : vector<1x8x32xf32> to vector<1x8x32xbf16>
    "tpu.trace_start"() <{level = 10 : i32, message = "blm,bmh->blh"}> : () -> ()
    %cst_24 = arith.constant dense<0.000000e+00> : vector<1x16x32xf32>
    %37 = tpu.matmul %35, %36, %cst_24 {dimension_numbers = #tpu.dot_dimension_numbers<[2], [1], [1], [2], [0, 0, 0, 1, 1, 2], [0], [0]>} : vector<1x16x8xbf16>, vector<1x8x32xbf16>, vector<1x16x32xf32> -> vector<1x16x32xf32>
    "tpu.trace_stop"() : () -> ()
    %cst_25 = arith.constant dense<0xFF800000> : vector<1x1xf32>
    %38 = vector.multi_reduction <maximumf>, %26, %cst_25 [1] : vector<1x16x1xf32> to vector<1x1xf32>
    %39 = vector.shape_cast %38 : vector<1x1xf32> to vector<1x1x1xf32>
    %40 = vector.broadcast %39 : vector<1x1x1xf32> to vector<1x16x1xf32>
    %41 = arith.subf %26, %40 : vector<1x16x1xf32>
    %42 = math.exp %41 : vector<1x16x1xf32>
    %cst_26 = arith.constant dense<0.000000e+00> : vector<1x1xf32>
    %43 = vector.multi_reduction <add>, %42, %cst_26 [1] : vector<1x16x1xf32> to vector<1x1xf32>
    %44 = vector.shape_cast %43 : vector<1x1xf32> to vector<1x1x1xf32>
    %45 = tpu.reciprocal %44 {approx = true} : vector<1x1x1xf32> -> vector<1x1x1xf32>
    %46 = vector.broadcast %45 : vector<1x1x1xf32> to vector<1x16x1xf32>
    %47 = arith.mulf %42, %46 : vector<1x16x1xf32>
    %cst_27 = arith.constant dense<0.000000e+00> : vector<1x1x32xf32>
    %48 = tpu.matmul %47, %17, %cst_27 {dimension_numbers = #tpu.dot_dimension_numbers<[1], [1], [2], [2], [0, 0, 0, 2, 1, 2], [0], [0]>} : vector<1x16x1xf32>, vector<1x16x32xf32>, vector<1x1x32xf32> -> vector<1x1x32xf32>
    %c0_28 = arith.constant 0 : index
    %c0_29 = arith.constant 0 : index
    %c0_30 = arith.constant 0 : index
    %49 = vector.load %arg9[%c0_28, %c0_29, %c0_30] : memref<1x16x128xf32, #tpu.memory_space<vmem>>, vector<1x16x32xf32>
    tpu.vector_store %arg9[%c0_28, %c0_29, %c0_30], %17 {strides = array<i32>} : memref<1x16x128xf32, #tpu.memory_space<vmem>>, vector<1x16x32xf32>,
    %c0_31 = arith.constant 0 : index
    %c0_32 = arith.constant 0 : index
    %c32 = arith.constant 32 : index
    %50 = vector.load %arg9[%c0_31, %c0_32, %c32] : memref<1x16x128xf32, #tpu.memory_space<vmem>>, vector<1x16x32xf32>
    tpu.vector_store %arg9[%c0_31, %c0_32, %c32], %37 {strides = array<i32>} : memref<1x16x128xf32, #tpu.memory_space<vmem>>, vector<1x16x32xf32>,
    %51 = arith.mulf %17, %37 : vector<1x16x32xf32>
    %c0_33 = arith.constant 0 : index
    %c0_34 = arith.constant 0 : index
    %c64 = arith.constant 64 : index
    %52 = vector.load %arg9[%c0_33, %c0_34, %c64] : memref<1x16x128xf32, #tpu.memory_space<vmem>>, vector<1x16x32xf32>
    tpu.vector_store %arg9[%c0_33, %c0_34, %c64], %51 {strides = array<i32>} : memref<1x16x128xf32, #tpu.memory_space<vmem>>, vector<1x16x32xf32>,
    %53 = vector.broadcast %48 : vector<1x1x32xf32> to vector<1x16x32xf32>
    %54 = arith.mulf %53, %37 : vector<1x16x32xf32>
    %c0_35 = arith.constant 0 : index
    %c0_36 = arith.constant 0 : index
    %c96 = arith.constant 96 : index
    %55 = vector.load %arg9[%c0_35, %c0_36, %c96] : memref<1x16x128xf32, #tpu.memory_space<vmem>>, vector<1x16x32xf32>
    tpu.vector_store %arg9[%c0_35, %c0_36, %c96], %54 {strides = array<i32>} : memref<1x16x128xf32, #tpu.memory_space<vmem>>, vector<1x16x32xf32>,
    %c0_37 = arith.constant 0 : index
    %c0_38 = arith.constant 0 : index
    %c0_39 = arith.constant 0 : index
    %56 = vector.load %arg10[%c0_37, %c0_38, %c0_39] : memref<1x8x32xf32, #tpu.memory_space<vmem>>, vector<1x8x32xf32>
    tpu.vector_store %arg10[%c0_37, %c0_38, %c0_39], %24 {strides = array<i32>} : memref<1x8x32xf32, #tpu.memory_space<vmem>>, vector<1x8x32xf32>,
    return
  }
  func.func @transform_0(%arg0: i32) -> (i32, i32, i32) {
    %c0_i32 = arith.constant 0 : i32
    %c0_i32_0 = arith.constant 0 : i32
    %c0_i32_1 = arith.constant 0 : i32
    return %arg0, %c0_i32, %c0_i32_0 : i32, i32, i32
  }
  func.func @transform_1(%arg0: i32) -> (i32, i32, i32) {
    %c0_i32 = arith.constant 0 : i32
    %c0_i32_0 = arith.constant 0 : i32
    %c0_i32_1 = arith.constant 0 : i32
    return %arg0, %c0_i32, %c0_i32_0 : i32, i32, i32
  }
  func.func @transform_2(%arg0: i32) -> (i32, i32, i32) {
    %c0_i32 = arith.constant 0 : i32
    %c0_i32_0 = arith.constant 0 : i32
    %c0_i32_1 = arith.constant 0 : i32
    return %arg0, %c0_i32, %c0_i32_0 : i32, i32, i32
  }
  func.func @transform_3(%arg0: i32) -> (i32, i32, i32) {
    %c0_i32 = arith.constant 0 : i32
    %c0_i32_0 = arith.constant 0 : i32
    %c0_i32_1 = arith.constant 0 : i32
    return %arg0, %c0_i32, %c0_i32_0 : i32, i32, i32
  }
  func.func @transform_4(%arg0: i32) -> (i32, i32) {
    %c0_i32 = arith.constant 0 : i32
    %c0_i32_0 = arith.constant 0 : i32
    %c0_i32_1 = arith.constant 0 : i32
    return %c0_i32, %c0_i32_0 : i32, i32
  }
  func.func @transform_5(%arg0: i32) -> (i32, i32) {
    %c0_i32 = arith.constant 0 : i32
    %c0_i32_0 = arith.constant 0 : i32
    %c0_i32_1 = arith.constant 0 : i32
    return %c0_i32, %c0_i32_0 : i32, i32
  }
  func.func @transform_6(%arg0: i32) -> (i32, i32) {
    %c0_i32 = arith.constant 0 : i32
    %c0_i32_0 = arith.constant 0 : i32
    %c0_i32_1 = arith.constant 0 : i32
    return %c0_i32, %c0_i32_0 : i32, i32
  }
  func.func @transform_7(%arg0: i32) -> (i32, i32) {
    %c0_i32 = arith.constant 0 : i32
    %c0_i32_0 = arith.constant 0 : i32
    %c0_i32_1 = arith.constant 0 : i32
    return %c0_i32, %c0_i32_0 : i32, i32
  }
  func.func @transform_8(%arg0: i32) -> (i32, i32, i32) {
    %c0_i32 = arith.constant 0 : i32
    %c0_i32_0 = arith.constant 0 : i32
    %c0_i32_1 = arith.constant 0 : i32
    return %arg0, %c0_i32, %c0_i32_0 : i32, i32, i32
  }
  func.func @transform_9(%arg0: i32) -> (i32, i32, i32) {
    %c0_i32 = arith.constant 0 : i32
    %c0_i32_0 = arith.constant 0 : i32
    %c0_i32_1 = arith.constant 0 : i32
    return %arg0, %c0_i32, %c0_i32_0 : i32, i32, i32
  }
}

</mosaic_0001>

<bundles_post_ra>
// kernel: tpu_custom_call.1
= control target key start
LH: loop header
LB: loop body
LE: loop exit
PB: predicated region body
PF: predicated region fallthrough
CT: control target
= control target key end

     0   :  { %s1765_s0 = inlined_call_operand.vmem [shape: bf16[2,16,32], index: 0, kind: input, shape index: {}]   ;;  %s1766_s1 = inlined_call_operand.hbm [shape: bf16[2,8,32], index: 1, kind: input, shape index: {}]   ;;  %s1767_s2 = inlined_call_operand.vmem [shape: f32[2,16,1], index: 2, kind: input, shape index: {}]   ;;  %s1768_s3 = inlined_call_operand.hbm [shape: f32[2,1,8], index: 3, kind: input, shape index: {}]   ;;  %s1769_s4 = inlined_call_operand.vmem [shape: bf16[32,32], index: 4, kind: input, shape index: {}]   ;;  %s1770_s5 = inlined_call_operand.vmem [shape: f32[1,32], index: 5, kind: input, shape index: {}]   ;;  %s1771_s6 = inlined_call_operand.vmem [shape: bf16[32,32], index: 6, kind: input, shape index: {}]   ;;  %s1772_s7 = inlined_call_operand.vmem [shape: f32[1,32], index: 7, kind: input, shape index: {}]   ;;  %s1773_s8 = inlined_call_operand.hbm [shape: f32[2,16,128], index: 8, kind: output, shape index: {0}]   ;;  %s1774_s9 = inlined_call_operand.hbm [shape: f32[2,8,32], index: 9, kind: output, shape index: {1}]  }
   0x1   :  { %1777 = sst [smem:[#allocation15_spill]] %s1766_s1 }
   0x2   :  { %15 = vsyncpa [#allocation3], 0 }
   0x3   :  { %17 = vsyncpa [#allocation3 + $0x1], 0 }
   0x4   :  { %18 = vsyncpa [#allocation6], 0 }
   0x5   :  { %20 = vsyncpa [#allocation6 + $0x1], 0 }
   0x6   :  { %21 = vsyncpa [#allocation4], 0 }
   0x7   :  { %23 = vsyncpa [#allocation4 + $0x1], 0 }
   0x8   :  { %24 = vsyncpa [#allocation9], 0 }
   0x9   :  { %26 = vsyncpa [#allocation9 + $0x1], 0  ;;  %s1469_s30 = smov 0   ;;  %s1471_s10 = smov 0  }
   0xa   :  { %s1473_s11 = smov 0   ;;  %s1475_s12 = smov 0  }
   0xb LB: > { %s1490_s13 = sadd.s32 4294967295, %s1404_s12   ;;  %s1069_s14 = sadd.s32 4294967294, %s1404_s12   ;;  %s1404_s12 = sphi %s1475_s12, %s1797_s12   ;;  %s1400_s11 = sphi %s1473_s11, %s1796_s11   ;;  %s1396_s10 = sphi %s1471_s10, %s1795_s10   ;;  %s1392_s30 = sphi %s1469_s30, %s1794_s30  }
   0xc   : > { %s1494_s15 = sadd.s32 1, %s1404_s12   ;;  %s65_s16 = sadd.s32 1, %s1400_s11 }
   0xd   : > { %s62_s17 = ssub.s32 %s1404_s12, %s1494_s15  ;;  %p72_p0 = scmp.ne.s32.totalorder %s1400_s11, %s1396_s10 }
   0xe   : > { %p63_p1 = scmp.eq.s32.totalorder %s62_s17, 0  ;;  %p73_p2 = scmp.eq.s32.totalorder %s1404_s12, 0 }
   0xf   : > { %p78_p3 = scmp.ne.s32.totalorder %s1396_s10, %s1392_s30  ;;  %p79_p4 = scmp.eq.s32.totalorder %s1490_s13, 0 }
  0x10   : > { %s1506_s18 = scalar_select %p63_p1, %s1400_s11, %s65_s16  }
  0x11   : > { %p1508_p5 = por %p73_p2, %p72_p0  ;;  %p1512_p6 = por %p79_p4, %p78_p3 }
  0x12   : > { %1778 = sst [smem:[#allocation14_spill]] %s1506_s18  ;;  %p238_p7 = scmp.eq.s32.totalorder %s1490_s13, 1 }
  0x13   : > { %s1780_s20 = scalar_select %p1512_p6, 1, 0 }
  0x14   : > { %p244_p8 = scmp.eq.s32.totalorder %s1069_s14, 1  ;;  %p1179_p10 = scmp.lt.s32.totalorder %s1404_s12, 2 }
  0x15   : > { %p1519_p11 = por %p238_p7, %p72_p0  ;;  %s1528_s23 = sand.u32 1, %s1400_s11  }
  0x16   : > { %p1523_p12 = por %p244_p8, %p78_p3  ;;  %s1073_s24 = sshll.u32 %s1404_s12, 6 }
  0x17   : > { %s1781_s21 = scalar_select %p1519_p11, 1, 0 }
  0x18   : > { %s1782_s22 = scalar_select %p1523_p12, 1, 0 }
  0x19   : > { %s1072_s25 = sshll.u32 %s1528_s23, 2  ;;  %s1783_s1 = sld [smem:[#allocation15_spill]] }
  0x1a   : > { %s314_s29 = scalar_lea.vmem [#allocation2], %s1072_s25  ;;  %p1539_p13 = pnand %p1179_p10, %p1508_p5 }
  0x1b   : > { %s321_s14 = sshll.u32 %s314_s29, 4  ;;  %s311_s17 = scalar_lea.sflag [#allocation3], %s1528_s23  ;;  %s1543_s14 = int_to_ptr.vmem [resolvable:$true] %s321_s14 }
  0x1c   : > { %p1244_p3 = pneg %p1539_p13 }
  0x1f   : > { %s1535_s28 = scalar_lea.hbm %s1783_s1, %s1073_s24  ;;  %s1247_s26 = scalar_lea.hbm %s1783_s1, 128 }
  0x20   : > { %s1242_s24 = scalar_lea.hbm %s1535_s28, 64  ;;  %p1248_p5 = scmp.lt.u32.totalorder %s1535_s28, %s1783_s1 }
  0x21   : > { %p1243_p2 = scmp.ne.s32.totalorder %s1535_s28, %s1242_s24  ;;  %p1249_p8 = scmp.lt.u32.totalorder %s1247_s26, %s1242_s24 }
  0x22   : > { %p1251_p9 = scmp.lt.u32.totalorder %s1242_s24, %s1535_s28 }
  0x23   : > { %p1245_p4 = pnand %p1244_p3, %p1243_p2  ;;  %p1250_p10 = por %p1249_p8, %p1248_p5 }
  0x25   : > { %p1246_p7 = pneg %p1245_p4  ;;  %p1252_p0 = por %p1251_p9, %p1250_p10 }
  0x27   : > { %p1253_p1 = pnand %p1252_p0, %p1246_p7 }
  0x29   : > { %1256 = shalt.err (!%p1253_p1)
}
  0x2a   : > { %s1257_s18 = scalar_lea.vmem %s1543_s14, 64  ;;  %s1406_s19 = smov [#allocation2]  }
  0x2b   : > { %p1258_p2 = scmp.ne.s32.totalorder %s1543_s14, %s1257_s18  ;;  %s1262_s25 = sshll.u32 %s1406_s19, 4  ;;  %s1263_s25 = int_to_ptr.vmem [resolvable:$false] %s1262_s25 }
  0x2c   : > { %s1264_s27 = scalar_lea.vmem %s1263_s25, 128  ;;  %p1265_p11 = scmp.lt.s32.totalorder %s1543_s14, %s1263_s25 }
  0x2d   : > { %p1260_p4 = pnand %p1258_p2, %p1244_p3  ;;  %p1266_p5 = scmp.lt.s32.totalorder %s1264_s27, %s1257_s18 }
  0x2f   : > { %p1261_p12 = pneg %p1260_p4  ;;  %p1267_p8 = por %p1266_p5, %p1265_p11 }
  0x31   : > { %p1268_p9 = pnand %p1267_p8, %p1261_p12 }
  0x33   : > { %1271 = shalt.err (!%p1268_p9)
}
  0x34   : > { %1168 = dma.hbm_to_vmem [thread:$0]  (!%p1539_p13), %s1535_s28, 64, %s1543_s14, %s311_s17  }
  0x35   : > { %p1785_p0 = scmp.lt.s32.totalorder %s1404_s12, 3  ;;  %p1786_p1 = scmp.ge.s32.totalorder %s1404_s12, 1 }
  0x36   : > { %s1074_s18 = sshll.u32 %s1404_s12, 4  ;;  %s339_s25 = scalar_lea.vmem [#allocation5], %s1528_s23 }
  0x37   : > { %p1577_p7 = pnand %p1786_p1, %p1785_p0  ;;  %s1585_s19 = scalar_lea.hbm %s1768_s3, %s1074_s18 }
  0x38   : > { %s346_s27 = sshll.u32 %s339_s25, 4  ;;  %s337_s28 = scalar_lea.sflag [#allocation6], %s1528_s23  ;;  %s347_s27 = int_to_ptr.vmem [resolvable:$true] %s346_s27 }
  0x39   : > { %s1787_s24 = scalar_select %p1577_p7, 1, 0 }
  0x3a   : > { %s1272_s14 = scalar_lea.hbm %s1585_s19, 16  ;;  %s1277_s26 = scalar_lea.hbm %s1768_s3, 32 }
  0x3b   : > { %p1273_p11 = scmp.ne.s32.totalorder %s1585_s19, %s1272_s14  ;;  %p1278_p2 = scmp.lt.u32.totalorder %s1585_s19, %s1768_s3 }
  0x3c   : > { %p1279_p4 = scmp.lt.u32.totalorder %s1277_s26, %s1272_s14  ;;  %p1281_p8 = scmp.lt.u32.totalorder %s1272_s14, %s1585_s19 }
  0x3d   : > { %p1275_p12 = pnand %p1273_p11, %p1244_p3 }
  0x3e   : > { %p1280_p5 = por %p1279_p4, %p1278_p2 }
  0x3f   : > { %p1276_p10 = pneg %p1275_p12 }
  0x40   : > { %p1282_p9 = por %p1281_p8, %p1280_p5 }
  0x42   : > { %p1283_p0 = pnand %p1282_p9, %p1276_p10 }
  0x44   : > { %1286 = shalt.err (!%p1283_p0)
}
  0x45   : > { %s1287_s23 = scalar_lea.vmem %s347_s27, 16  ;;  %s1407_s25 = smov [#allocation5]  }
  0x46   : > { %p1288_p1 = scmp.ne.s32.totalorder %s347_s27, %s1287_s23  ;;  %s1292_s1 = sshll.u32 %s1407_s25, 4  ;;  %s1293_s1 = int_to_ptr.vmem [resolvable:$false] %s1292_s1 }
  0x47   : > { %s1294_s17 = scalar_lea.vmem %s1293_s1, 32  ;;  %p1295_p6 = scmp.lt.s32.totalorder %s347_s27, %s1293_s1 }
  0x48   : > { %p1290_p11 = pnand %p1288_p1, %p1244_p3  ;;  %p1296_p7 = scmp.lt.s32.totalorder %s1294_s17, %s1287_s23 }
  0x4a   : > { %p1291_p12 = pneg %p1290_p11  ;;  %p1297_p2 = por %p1296_p7, %p1295_p6 }
  0x4c   : > { %p1298_p4 = pnand %p1297_p2, %p1291_p12 }
  0x4e   : > { %1301 = shalt.err (!%p1298_p4)
}
  0x4f   : > { %1171 = dma.hbm_to_vmem [thread:$0]  (!%p1539_p13), %s1585_s19, 16, %s347_s27, %s337_s28  }
  0x50   : > { %p1788_p10 = scmp.ne.s32.totalorder %s1787_s24, 0 }
  0x51   : > { %s1611_s14 = sand.u32 (!%p1788_p10), 1, %s1396_s10   ;;  %p1789_p3 = scmp.ne.s32.totalorder (!%p1788_p10), %s1780_s20, 0 }
  0x52   : > { %355 = sbr.rel (%p1788_p10) target bundleno = 1024 (0x400), region = 52  ;;  %s1076_s26 = sshll.u32 (!%p1788_p10), %s1611_s14, 2 }
  0x53   : > { %s358_s18 = scalar_lea.sflag (!%p1788_p10), [#allocation3], %s1611_s14  ;;  %s361_s29 = scalar_lea.vmem (!%p1788_p10), [#allocation2], %s1076_s26 }
  0x59   : > { %1375 = dma.done.wait (%p1789_p3), %s358_s18, 64  }
  0x5a   : > { %1377 = vsyncadd (%p1789_p3), %s358_s18, 4294967232  ;;  %s367_s16 = scalar_lea.sflag [#allocation6], %s1611_s14  ;;  %s369_s24 = scalar_lea.vmem [#allocation5], %s1611_s14 }
  0x5b   : > { %1379 = dma.done.wait (%p1789_p3), %s367_s16, 16  }
  0x5c   : > { %1381 = vsyncadd (%p1789_p3), %s367_s16, 4294967280  ;;  %p423_p6 = scmp.lt.s32.totalorder %s1490_s13, 1  ;;  %v1408_v0 = vmov 0.0   ;;  %vm1409_vm0 = vmmov 0   ;;  %v1410_v1 = vmov 0   ;;  %vm442_vm1 = vcmask 261120  }
  0x5d   : > { %1119 = vmatprep.subr.bf16.mxu0 %v1408_v0  ;;  %1121 = vmatprep.mubr.msk.bf16.mxu0 %vm1409_vm0, %v1408_v0  ;;  %v436_v2 = vld [vmem:[%s361_s29] sm:$0xf]  ;;  %v1225_v9 = vld [vmem:[%s1771_s6 + $0x8] sm:$0xff]   ;;  %vm642_vm2 = vcmask 64512   ;;  %vm670_vm3 = vcmask 1043456   ;;  %s1077_s1 = sshll.u32 %s1611_s14, 4 }
  0x5e   : > { %s424_s19 = scalar_select %p423_p6, %s1490_s13, 1  ;;  %1222 = vset.pattern.permute.xlu0 %v1410_v1  ;;  %1125 = vmatprep.subr.bf16.mxu1 %v1408_v0  ;;  %v447_v3 = vsel %vm442_vm1, %v436_v2, 0  ;;  %v1224_v7 = vld [vmem:[%s1771_s6] sm:$0xff]   ;;  %v1227_v10 = vld [vmem:[%s1769_s4 + $0x8] sm:$0xff]   ;;  %vm770_vm4 = vcmask 130048  }
  0x5f   : > { %1129 = vmatprep.mubr.msk.bf16.mxu1 %vm1409_vm0, %v1408_v0  ;;  %1120 = vmatpush3.bf16.xpose.msra.mxu0 %v447_v3  ;;  %v1226_v8 = vld [vmem:[%s1769_s4] sm:$0xff]   ;;  %v1411_v3 = vmov 0.0|0.0   ;;  %s1670_s18 = scalar_lea.vmem [#allocation7], %s1077_s1  ;;  %s1078_s16 = sshll.u32 %s1611_s14, 3 }
  0x60   : > { %s1103_s27 = sshll.u32 %s424_s19, 3  ;;  %s1104_s28 = sshll.u32 %s424_s19, 4  ;;  %1133 = vmatprep.subr.bf16.mxu0 %v1408_v0  ;;  %1126 = vmatpush3.bf16.msra.mxu1 %v1226_v8  ;;  %v1085_v16 = vld [vmem:[%s369_s24] ss:$0 sm:$0xff] }
  0x61   : > { %s432_s25 = scalar_lea.vmem %s1767_s2, %s1104_s28  ;;  %s427_s26 = scalar_lea.vmem %s1765_s0, %s1103_s27  ;;  %1127 = vmatprep.subr.bf16.mxu1 %v1408_v0  ;;  %v1090_v53 = vld [vmem:[%s1772_s7] ss:$0 sm:$0xff] }
  0x62   : > { %v492_v4 = vld [vmem:[%s432_s25] sm:$0xff]  ;;  %v493_v5 = vld [vmem:[%s432_s25 + $0x8] sm:$0xff]  ;;  %s1677_s19 = scalar_lea.vmem [#allocation8], %s1078_s16  ;;  %s1412_s27 = smov 32  }
  0x63   : > { %496 = vperm.xlu0 %1222, %v492_v4   ;;  %v1223_v6 = vld [vmem:[%s427_s26] sm:$0xff]   ;;  %s1413_s29 = smov 64   ;;  %s1100_s28 = sshll.u32 %s1490_s13, 7 }
  0x64   : > { %1128 = vmatpush3.bf16.msra.mxu1 %v1227_v10  ;;  %v1086_v63 = vld [vmem:[%s1770_s5] ss:$0 sm:$0xff]  ;;  %s923_s23 = sshll.u32 %s1677_s19, 4  ;;  %s1688_s25 = scalar_lea.hbm %s1774_s9, %s1100_s28  ;;  %s924_s23 = int_to_ptr.vmem [resolvable:$true] %s923_s23 }
  0x65   : > { %1141 = vmatprep.subr.bf16.mxu1 %v1408_v0  ;;  %s894_s1 = scalar_lea.sflag [#allocation9], %s1611_s14  ;;  %s1302_s17 = scalar_lea.vmem %s924_s23, 128 }
  0x66   : > { %1122 = vmatmul.mubr.msk.bf16.vlgmr.msra.gmra.mrb[0].mxu0 %vm442_vm1, %v1223_v6  ;;  %p1303_p13 = scmp.ne.s32.totalorder %s924_s23, %s1302_s17  ;;  %p1790_p7 = scmp.ne.s32.totalorder %s1781_s21, 0 }
  0x67   : > { %501 = vperm.xlu0 %1222, %v493_v5   ;;  %1137 = vmatprep.mubr.msk.bf16.mxu0 %vm1409_vm0, %v1408_v0  ;;  %s1414_s26 = smov [#allocation8]  }
  0x68   : > { %1134 = vmatpush3.bf16.msra.mxu0 %v1224_v7  ;;  %1130 = vmatmul.mubr.msk.bf16.vlgmr.msra.gmra.mrb[0].mxu1 %vm442_vm1, %v1223_v6  ;;  %p1304_p5 = pnand %p1303_p13, %p1790_p7  ;;  %s1306_s16 = sshll.u32 %s1414_s26, 4  ;;  %s1307_s16 = int_to_ptr.vmem [resolvable:$false] %s1306_s16 }
  0x69   : > { %1135 = vmatprep.subr.bf16.mxu0 %v1408_v0  ;;  %1143 = vmatprep.mubr.msk.bf16.mxu1 %vm1409_vm0, %v1408_v0  ;;  %p1309_p9 = scmp.lt.s32.totalorder %s924_s23, %s1307_s16 }
  0x6a   : > { %p1305_p8 = pneg %p1304_p5 }
  0x6c   : > { %1136 = vmatpush3.bf16.msra.mxu0 %v1225_v9 }
  0x6d   : > { %1154 = vmatprep.subr.bf16.mxu0 %v1411_v3 }
  0x6f   : > { %1138 = vmatmul.mubr.msk.bf16.vlgmr.msra.gmra.mrb[4].mxu0 %vm442_vm1, %v436_v2 }
  0x70   : > { %1151 = vmatprep.mubr.msk.f32.mxu0 %vm1409_vm0, %v1408_v0 }
  0xe2   : > { %v497_v11 = vpop.permute.xlu0 %496 }
  0xe6   : > { %v502_v20 = vpop.permute.xlu0 %501 }
 0x139   : > { %v483_v12 = vpop.f32.mrb[0].mxu0 }
 0x13a   : > { %v490_v13 = vmul.f32 0.17677669, %v483_v12  ;;  %v1123_v14 = vpop.f32.mrb[1].mxu0 }
 0x13b   : > { %v486_v15 = vpop.f32.mrb[2].mxu0  ;;  %v572_v0 = vpop.f32.mrb[0].mxu1 }
 0x13c   : > { %v504_v17 = vadd.f32 %v497_v11, %v490_v13  ;;  %v491_v18 = vmul.f32 0.17677669, %v486_v15  ;;  %v1124_v19 = vpop.f32.mrb[3].mxu0  ;;  %v573_v1 = vadd.f32 %v1086_v63, %v572_v0  ;;  %v1131_v2 = vpop.f32.mrb[1].mxu1 }
 0x13d   : > { %v575_v4 = vpop.f32.mrb[2].mxu1 }
 0x13e   : > { %v505_v21 = vadd.f32 %v502_v20, %v491_v18  ;;  %v513_v22 = vadd.f32 %v1085_v16, %v504_v17  ;;  %844 = vst.msk [vmem:[%s1670_s18] sm:$0xff] %vm442_vm1, %v573_v1  ;;  %v576_v6 = vadd.f32 %v1086_v63, %v575_v4  ;;  %v1132_v7 = vpop.f32.mrb[3].mxu1 }
 0x140   : > { %v643_v23 = vsel %vm642_vm2, %v513_v22, -inf  ;;  %v514_v24 = vadd.f32 %v1085_v16, %v505_v21  ;;  %v1155_v8 = vpack.c.bf16 %v576_v6, %v573_v1  ;;  %845 = vst.msk [vmem:[%s1670_s18 + $0x8] sm:$0xff] %vm442_vm1, %v576_v6 }
 0x141   : > { %644 = vmax.xlane.f32.xlu1 %v643_v23 }
 0x142   : > { %v646_v25 = vsel %vm642_vm2, %v514_v24, -inf  ;;  %v636_v54 = vpop.f32.mrb[4].mxu0  ;;  %1156 = vmatpush3.bf16.msra.mxu0 %v1155_v8 }
 0x143   : > { %v637_v55 = vadd.f32 %v1090_v53, %v636_v54  ;;  %v1139_v56 = vpop.f32.mrb[5].mxu0 }
 0x144   : > { %v639_v57 = vpop.f32.mrb[6].mxu0 }
 0x145   : > { %647 = vmax.xlane.f32.xlu1 %v646_v25  ;;  %v666_v59 = vpack.c.bf16 %v637_v55, %v637_v55  ;;  %v1140_v60 = vpop.f32.mrb[7].mxu0  ;;  %887 = vst.msk [vmem:[%s1677_s19] sm:$0xff] %vm442_vm1, %v637_v55 }
 0x147   : > { %v672_v61 = vsel %vm670_vm3, %v666_v59, 0 }
 0x148   : > { %1142 = vmatpush3.bf16.msra.mxu1 %v672_v61 }
 0x1ce   : > { %v645_v26 = vpop.xlane.xlu1 %644 }
 0x1cf   : > { %v649_v27 = vsub.f32 %v513_v22, %v645_v26 }
 0x1d1   : > { %v651_v28 = vmul.f32 1.442695, %v649_v27 }
 0x1d2   : > { %v648_v29 = vpop.xlane.xlu1 %647 }
 0x1d3   : > { %1228 = vpow2.f32 %v651_v28  ;;  %v650_v30 = vsub.f32 %v514_v24, %v648_v29  ;;  %v715_v31 = vmax.f32 %v645_v26, %v648_v29 }
 0x1d5   : > { %v653_v32 = vmul.f32 1.442695, %v650_v30  ;;  %v716_v33 = vrot.slane %v715_v31, 4 }
 0x1d7   : > { %1230 = vpow2.f32 %v653_v32  ;;  %v717_v34 = vmax.f32 %v715_v31, %v716_v33 }
 0x1d9   : > { %v718_v35 = vrot.slane %v717_v34, 2 }
 0x1db   : > { %v719_v36 = vmax.f32 %v717_v34, %v718_v35 }
 0x1dd   : > { %v1658_v37 = vpop.eup %1228  ;;  %v720_v38 = vrot.slane %v719_v36, 1 }
 0x1de   : > { %v655_v39 = vsel %vm642_vm2, %v1658_v37, 0.0 }
 0x1df   : > { %v721_v40 = vmax.f32 %v719_v36, %v720_v38  ;;  %656 = vadd.xlane.f32.xlu0 %v655_v39 }
 0x1e1   : > { %v1231_v41 = vpop.eup %1230  ;;  %v722_v42 = vsub.f32 %v645_v26, %v721_v40  ;;  %v723_v43 = vsub.f32 %v648_v29, %v721_v40  ;;  %v870_v26 = vlaneseq }
 0x1e2   : > { %v658_v44 = vsel %vm642_vm2, %v1231_v41, 0.0 }
 0x1e3   : > { %v724_v45 = vmul.f32 1.442695, %v722_v42  ;;  %v726_v46 = vmul.f32 1.442695, %v723_v43  ;;  %659 = vadd.xlane.f32.xlu1 %v658_v44  ;;  %v871_v27 = vshrl.u32 %v870_v26, 7 }
 0x1e5   : > { %1232 = vpow2.f32 %v724_v45  ;;  %v872_v28 = vsub.s32 0, %v871_v27 }
 0x1e6   : > { %1234 = vpow2.f32 %v726_v46 }
 0x1ef   : > { %v1233_v47 = vpop.eup %1232 }
 0x1f0   : > { %v1235_v48 = vpop.eup %1234 }
 0x1f1   : > { %v728_v49 = vadd.f32 %v1235_v48, %v1233_v47 }
 0x1f3   : > { %v729_v50 = vrot.slane %v728_v49, 4 }
 0x1f5   : > { %v730_v51 = vadd.f32 %v729_v50, %v728_v49 }
 0x1f7   : > { %v731_v52 = vrot.slane %v730_v51, 2 }
 0x1f9   : > { %v732_v58 = vadd.f32 %v731_v52, %v730_v51 }
 0x1fb   : > { %v733_v62 = vrot.slane %v732_v58, 1 }
 0x1fd   : > { %v734_v5 = vadd.f32 %v733_v62, %v732_v58 }
 0x1ff   : > { %1236 = vrcp.f32 %v734_v5 }
 0x209   : > { %v1237_v9 = vpop.eup %1236 }
 0x20a   : > { %v736_v10 = vmul.f32 %v1237_v9, %v1233_v47  ;;  %v737_v11 = vmul.f32 %v1237_v9, %v1235_v48 }
 0x216   : > { %738 = vxpose.xlu1.b32.start [1/2] (short) (narrow) %v736_v10, 8 }
 0x21a   : > { %739 = vxpose.xlu1.b32.end [2/2] (short) (narrow) %v737_v11, 8 }
 0x26c   : > { %v657_v12 = vpop.xlane.xlu0 %656 }
 0x26d   : > { %1238 = vrcp.f32 %v657_v12 }
 0x270   : > { %v660_v13 = vpop.xlane.xlu1 %659 }
 0x271   : > { %1240 = vrcp.f32 %v660_v13 }
 0x277   : > { %v1239_v14 = vpop.eup %1238 }
 0x278   : > { %v663_v16 = vmul.f32 %v1239_v14, %v1658_v37 }
 0x27b   : > { %v1241_v15 = vpop.eup %1240 }
 0x27c   : > { %v664_v17 = vmul.f32 %v1241_v15, %v1231_v41 }
 0x27e   : > { %v665_v18 = vpack.c.bf16 %v664_v17, %v663_v16 }
 0x280   : > { %1144 = vmatmul.mubr.msk.bf16.vlgmr.msra.gmra.mrb[4].mxu1 %vm642_vm2, %v665_v18 }
 0x296   : > { %v754_v19 = vpop.trf.xlu1 }
 0x297   : > { %1152 = vmatmul.mubr.msk.f32.vlgmr.msra.gmra.mrb[8].mxu0 %vm770_vm4, %v754_v19 }
 0x353   : > { %v708_v20 = vpop.f32.mrb[4].mxu1 }
 0x354   : > { %848 = vrot.lane.b32.xlu0 %v708_v20, %s1412_s27  ;;  %v1145_v21 = vpop.f32.mrb[5].mxu1  ;;  %v857_v25 = vmul.f32 %v708_v20, %v573_v1 }
 0x355   : > { %v711_v22 = vpop.f32.mrb[6].mxu1 }
 0x356   : > { %v858_v23 = vmul.f32 %v711_v22, %v576_v6  ;;  %v1146_v24 = vpop.f32.mrb[7].mxu1 }
 0x358   : > { %850 = vrot.lane.b32.xlu0 %v711_v22, %s1412_s27  ;;  %863 = vrot.lane.b32.xlu1 %v858_v23, %s1413_s29  ;;  %s1308_s27 = scalar_lea.vmem %s1307_s16, 256 }
 0x359   : > { %p1310_p0 = scmp.lt.s32.totalorder %s1308_s27, %s1302_s17 }
 0x35b   : > { %p1311_p1 = por %p1310_p0, %p1309_p9 }
 0x35c   : > { %861 = vrot.lane.b32.xlu0 %v857_v25, %s1413_s29 }
 0x35d   : > { %p1312_p11 = pnand %p1311_p1, %p1305_p8 }
 0x36a   : > { %v840_v29 = vpop.f32.mrb[8].mxu0 }
 0x36b   : > { %v873_v30 = vrot.slane %v840_v29, %v872_v28  ;;  %v1153_v31 = vpop.f32.mrb[9].mxu0 }
 0x36c   : > { %1315 = shalt.err (!%p1312_p11)
}
 0x36d   : > { %s1316_s19 = scalar_lea.hbm %s1688_s25, 128  ;;  %s1320_s20 = scalar_lea.hbm %s1774_s9, 256 }
 0x36e   : > { %p1317_p12 = scmp.ne.s32.totalorder %s1688_s25, %s1316_s19  ;;  %p1321_p10 = scmp.lt.u32.totalorder %s1688_s25, %s1774_s9 }
 0x36f   : > { %p1322_p3 = scmp.lt.u32.totalorder %s1320_s20, %s1316_s19  ;;  %p1324_p13 = scmp.lt.u32.totalorder %s1316_s19, %s1688_s25 }
 0x370   : > { %p1318_p2 = pnand %p1317_p12, %p1790_p7 }
 0x371   : > { %p1323_p6 = por %p1322_p3, %p1321_p10 }
 0x372   : > { %p1319_p4 = pneg %p1318_p2 }
 0x373   : > { %p1325_p5 = por %p1324_p13, %p1323_p6 }
 0x375   : > { %p1326_p8 = pnand %p1325_p5, %p1319_p4 }
 0x377   : > { %1329 = shalt.err (!%p1326_p8)
}
 0x378   : > { %1162 = dma.vmem_to_hbm [thread:$0]  (%p1790_p7), %s924_s23, 128, %s1688_s25, %s894_s1   ;;  %v874_v32 = vmul.f32 %v873_v30, %v708_v20  ;;  %v875_v33 = vmul.f32 %v873_v30, %v711_v22  ;;  %vm854_vm5 = vcmask 523520   ;;  %vm867_vm6 = vcmask 785920  }
 0x379   : > { %s1415_s17 = smov 96   ;;  %vm884_vm7 = vcmask 1048320   ;;  %s1105_s23 = sshll.u32 %s1490_s13, 8 }
 0x37a   : > { %878 = vrot.lane.b32.xlu0 %v874_v32, %s1415_s17  ;;  %s907_s25 = sshll.u32 %s1670_s18, 4  ;;  %s1718_s27 = scalar_lea.hbm %s1773_s8, %s1105_s23  ;;  %s1720_s25 = int_to_ptr.vmem [resolvable:$true] %s907_s25 }
 0x37b   : > { %s889_s19 = scalar_lea.sflag [#allocation4], %s1611_s14  ;;  %s1330_s29 = scalar_lea.vmem %s1720_s25, 256 }
 0x37c   : > { %p1331_p9 = scmp.ne.s32.totalorder %s1720_s25, %s1330_s29  ;;  %s1416_s13 = smov [#allocation7]  }
 0x37d   : > { %s1334_s28 = sshll.u32 %s1416_s13, 4  ;;  %s1335_s28 = int_to_ptr.vmem [resolvable:$false] %s1334_s28 }
 0x37e   : > { %880 = vrot.lane.b32.xlu0 %v875_v33, %s1415_s17  ;;  %p1332_p0 = pnand %p1331_p9, %p1790_p7  ;;  %s1336_s20 = scalar_lea.vmem %s1335_s28, 512 }
 0x37f   : > { %p1337_p11 = scmp.lt.s32.totalorder %s1720_s25, %s1335_s28  ;;  %p1338_p12 = scmp.lt.s32.totalorder %s1336_s20, %s1330_s29 }
 0x380   : > { %p1333_p1 = pneg %p1332_p0 }
 0x381   : > { %p1339_p2 = por %p1338_p12, %p1337_p11 }
 0x383   : > { %p1340_p4 = pnand %p1339_p2, %p1333_p1 }
 0x3c6   : > { %v849_v34 = vpop.permute.xlu0 %848 }
 0x3c7   : > { %855 = vst.msk [vmem:[%s1670_s18] sm:$0xff] %vm854_vm5, %v849_v34 }
 0x3ca   : > { %v851_v35 = vpop.permute.xlu0 %850  ;;  %v864_v36 = vpop.permute.xlu1 %863 }
 0x3cb   : > { %856 = vst.msk [vmem:[%s1670_s18 + $0x8] sm:$0xff] %vm854_vm5, %v851_v35 }
 0x3cc   : > { %869 = vst.msk [vmem:[%s1670_s18 + $0x8] sm:$0xff] %vm867_vm6, %v864_v36 }
 0x3ce   : > { %v862_v37 = vpop.permute.xlu0 %861 }
 0x3cf   : > { %868 = vst.msk [vmem:[%s1670_s18] sm:$0xff] %vm867_vm6, %v862_v37 }
 0x3ec   : > { %v879_v38 = vpop.permute.xlu0 %878 }
 0x3ed   : > { %885 = vst.msk [vmem:[%s1670_s18] sm:$0xff] %vm884_vm7, %v879_v38 }
 0x3f0   : > { %v881_v39 = vpop.permute.xlu0 %880 }
 0x3f1   : > { %886 = vst.msk [vmem:[%s1670_s18 + $0x8] sm:$0xff] %vm884_vm7, %v881_v39 }
 0x3f2   : > { %1343 = shalt.err (!%p1340_p4)
}
 0x3f3   : > { %s1344_s18 = scalar_lea.hbm %s1718_s27, 256  ;;  %s1348_s17 = scalar_lea.hbm %s1773_s8, 512 }
 0x3f4   : > { %p1345_p10 = scmp.ne.s32.totalorder %s1718_s27, %s1344_s18  ;;  %p1349_p13 = scmp.lt.u32.totalorder %s1718_s27, %s1773_s8 }
 0x3f5   : > { %p1350_p5 = scmp.lt.u32.totalorder %s1348_s17, %s1344_s18  ;;  %p1352_p9 = scmp.lt.u32.totalorder %s1344_s18, %s1718_s27 }
 0x3f6   : > { %p1346_p3 = pnand %p1345_p10, %p1790_p7 }
 0x3f7   : > { %p1351_p8 = por %p1350_p5, %p1349_p13 }
 0x3f8   : > { %p1347_p6 = pneg %p1346_p3 }
 0x3f9   : > { %p1353_p0 = por %p1352_p9, %p1351_p8 }
 0x3fb   : > { %p1354_p1 = pnand %p1353_p0, %p1347_p6 }
 0x3fd   : > { %1357 = shalt.err (!%p1354_p1)
}
 0x3fe   : > { %s1417_s16 = smov 128   ;;  %s1418_s29 = smov 8  }
 0x3ff   : > { %1161 = dma.vmem_to_hbm [thread:$0]  (%p1790_p7), %s1720_s25, 256, %s1718_s27, %s889_s19, %s1417_s16, %s1417_s16, %s1418_s29  }
 0x400 PF: > { %s935_s13 = sand.u32 1, %s1392_s30   ;;  %p1791_p11 = scmp.ne.s32.totalorder %s1782_s22, 0 }
 0x401   : > { %p1792_p12 = scmp.ge.s32.totalorder %s1404_s12, 2  ;;  %s936_s28 = scalar_lea.sflag [#allocation4], %s935_s13 }
 0x403   : > { %p1173_p2 = pnand %p1792_p12, %p1791_p11 }
 0x405   : > { %1383 = dma.done.wait (!%p1173_p2), %s936_s28, 256  }
 0x406   : > { %1385 = vsyncadd (!%p1173_p2), %s936_s28, 4294967040  ;;  %s945_s20 = scalar_lea.sflag [#allocation9], %s935_s13 }
 0x407   : > { %1387 = dma.done.wait (!%p1173_p2), %s945_s20, 128  }
 0x408   : > { %1389 = vsyncadd (!%p1173_p2), %s945_s20, 4294967168  ;;  %s1793_s21 = sld [smem:[#allocation14_spill]]  ;;  %p29_p7 = scmp.ge.s32.totalorder %s1494_s15, 4  }
 0x409   : > { %s1794_s30 = smov %s1396_s10  ;;  %s1795_s10 = smov %s1400_s11 }
 0x40a   : > { %s1797_s12 = smov %s1494_s15  ;;  %31 = sbr.rel (!%p29_p7) target bundleno = 11 (0xb), region = 133 }
 0x40e   : > { %s1796_s11 = smov %s1793_s21 }
 0x411   :  { %950 = vsyncpa [#allocation3], 1 }
 0x412   :  { %952 = vsyncpa [#allocation3 + $0x1], 1 }
 0x413   :  { %953 = vsyncpa [#allocation6], 1 }
 0x414   :  { %955 = vsyncpa [#allocation6 + $0x1], 1 }
 0x415   :  { %956 = vsyncpa [#allocation4], 1 }
 0x416   :  { %958 = vsyncpa [#allocation4 + $0x1], 1 }
 0x417   :  { %959 = vsyncpa [#allocation9], 1 }
 0x418   :  { %961 = vsyncpa [#allocation9 + $0x1], 1 }

// kernel: tpu_custom_call.1
= control target key start
LH: loop header
LB: loop body
LE: loop exit
PB: predicated region body
PF: predicated region fallthrough
CT: control target
= control target key end

     0   :  { %s1765_s0 = inlined_call_operand.vmem [shape: bf16[2,16,32], index: 0, kind: input, shape index: {}]   ;;  %s1766_s1 = inlined_call_operand.hbm [shape: bf16[2,8,32], index: 1, kind: input, shape index: {}]   ;;  %s1767_s2 = inlined_call_operand.vmem [shape: f32[2,16,1], index: 2, kind: input, shape index: {}]   ;;  %s1768_s3 = inlined_call_operand.hbm [shape: f32[2,1,8], index: 3, kind: input, shape index: {}]   ;;  %s1769_s4 = inlined_call_operand.vmem [shape: bf16[32,32], index: 4, kind: input, shape index: {}]   ;;  %s1770_s5 = inlined_call_operand.vmem [shape: f32[1,32], index: 5, kind: input, shape index: {}]   ;;  %s1771_s6 = inlined_call_operand.vmem [shape: bf16[32,32], index: 6, kind: input, shape index: {}]   ;;  %s1772_s7 = inlined_call_operand.vmem [shape: f32[1,32], index: 7, kind: input, shape index: {}]   ;;  %s1773_s8 = inlined_call_operand.hbm [shape: f32[2,16,128], index: 8, kind: output, shape index: {0}]   ;;  %s1774_s9 = inlined_call_operand.hbm [shape: f32[2,8,32], index: 9, kind: output, shape index: {1}]  }
   0x1   :  { %1777 = sst [smem:[#allocation15_spill]] %s1766_s1 }
   0x2   :  { %15 = vsyncpa [#allocation3], 0 }
   0x3   :  { %17 = vsyncpa [#allocation3 + $0x1], 0 }
   0x4   :  { %18 = vsyncpa [#allocation6], 0 }
   0x5   :  { %20 = vsyncpa [#allocation6 + $0x1], 0 }
   0x6   :  { %21 = vsyncpa [#allocation4], 0 }
   0x7   :  { %23 = vsyncpa [#allocation4 + $0x1], 0 }
   0x8   :  { %24 = vsyncpa [#allocation9], 0 }
   0x9   :  { %26 = vsyncpa [#allocation9 + $0x1], 0  ;;  %s1469_s30 = smov 0   ;;  %s1471_s10 = smov 0  }
   0xa   :  { %s1473_s11 = smov 0   ;;  %s1475_s12 = smov 0  }
   0xb LB: > { %s1490_s13 = sadd.s32 4294967295, %s1404_s12   ;;  %s1069_s14 = sadd.s32 4294967294, %s1404_s12   ;;  %s1404_s12 = sphi %s1475_s12, %s1797_s12   ;;  %s1400_s11 = sphi %s1473_s11, %s1796_s11   ;;  %s1396_s10 = sphi %s1471_s10, %s1795_s10   ;;  %s1392_s30 = sphi %s1469_s30, %s1794_s30  }
   0xc   : > { %s1494_s15 = sadd.s32 1, %s1404_s12   ;;  %s65_s16 = sadd.s32 1, %s1400_s11 }
   0xd   : > { %s62_s17 = ssub.s32 %s1404_s12, %s1494_s15  ;;  %p72_p0 = scmp.ne.s32.totalorder %s1400_s11, %s1396_s10 }
   0xe   : > { %p63_p1 = scmp.eq.s32.totalorder %s62_s17, 0  ;;  %p73_p2 = scmp.eq.s32.totalorder %s1404_s12, 0 }
   0xf   : > { %p78_p3 = scmp.ne.s32.totalorder %s1396_s10, %s1392_s30  ;;  %p79_p4 = scmp.eq.s32.totalorder %s1490_s13, 0 }
  0x10   : > { %s1506_s18 = scalar_select %p63_p1, %s1400_s11, %s65_s16  }
  0x11   : > { %p1508_p5 = por %p73_p2, %p72_p0  ;;  %p1512_p6 = por %p79_p4, %p78_p3 }
  0x12   : > { %1778 = sst [smem:[#allocation14_spill]] %s1506_s18  ;;  %p238_p7 = scmp.eq.s32.totalorder %s1490_s13, 1 }
  0x13   : > { %s1780_s20 = scalar_select %p1512_p6, 1, 0 }
  0x14   : > { %p244_p8 = scmp.eq.s32.totalorder %s1069_s14, 1  ;;  %p1179_p10 = scmp.lt.s32.totalorder %s1404_s12, 2 }
  0x15   : > { %p1519_p11 = por %p238_p7, %p72_p0  ;;  %s1528_s23 = sand.u32 1, %s1400_s11  }
  0x16   : > { %p1523_p12 = por %p244_p8, %p78_p3  ;;  %s1073_s24 = sshll.u32 %s1404_s12, 6 }
  0x17   : > { %s1781_s21 = scalar_select %p1519_p11, 1, 0 }
  0x18   : > { %s1782_s22 = scalar_select %p1523_p12, 1, 0 }
  0x19   : > { %s1072_s25 = sshll.u32 %s1528_s23, 2  ;;  %s1783_s1 = sld [smem:[#allocation15_spill]] }
  0x1a   : > { %s314_s29 = scalar_lea.vmem [#allocation2], %s1072_s25  ;;  %p1539_p13 = pnand %p1179_p10, %p1508_p5 }
  0x1b   : > { %s321_s14 = sshll.u32 %s314_s29, 4  ;;  %s311_s17 = scalar_lea.sflag [#allocation3], %s1528_s23  ;;  %s1543_s14 = int_to_ptr.vmem [resolvable:$true] %s321_s14 }
  0x1c   : > { %p1244_p3 = pneg %p1539_p13 }
  0x1f   : > { %s1535_s28 = scalar_lea.hbm %s1783_s1, %s1073_s24  ;;  %s1247_s26 = scalar_lea.hbm %s1783_s1, 128 }
  0x20   : > { %s1242_s24 = scalar_lea.hbm %s1535_s28, 64  ;;  %p1248_p5 = scmp.lt.u32.totalorder %s1535_s28, %s1783_s1 }
  0x21   : > { %p1243_p2 = scmp.ne.s32.totalorder %s1535_s28, %s1242_s24  ;;  %p1249_p8 = scmp.lt.u32.totalorder %s1247_s26, %s1242_s24 }
  0x22   : > { %p1251_p9 = scmp.lt.u32.totalorder %s1242_s24, %s1535_s28 }
  0x23   : > { %p1245_p4 = pnand %p1244_p3, %p1243_p2  ;;  %p1250_p10 = por %p1249_p8, %p1248_p5 }
  0x25   : > { %p1246_p7 = pneg %p1245_p4  ;;  %p1252_p0 = por %p1251_p9, %p1250_p10 }
  0x27   : > { %p1253_p1 = pnand %p1252_p0, %p1246_p7 }
  0x29   : > { %1256 = shalt.err (!%p1253_p1)
}
  0x2a   : > { %s1257_s18 = scalar_lea.vmem %s1543_s14, 64  ;;  %s1406_s19 = smov [#allocation2]  }
  0x2b   : > { %p1258_p2 = scmp.ne.s32.totalorder %s1543_s14, %s1257_s18  ;;  %s1262_s25 = sshll.u32 %s1406_s19, 4  ;;  %s1263_s25 = int_to_ptr.vmem [resolvable:$false] %s1262_s25 }
  0x2c   : > { %s1264_s27 = scalar_lea.vmem %s1263_s25, 128  ;;  %p1265_p11 = scmp.lt.s32.totalorder %s1543_s14, %s1263_s25 }
  0x2d   : > { %p1260_p4 = pnand %p1258_p2, %p1244_p3  ;;  %p1266_p5 = scmp.lt.s32.totalorder %s1264_s27, %s1257_s18 }
  0x2f   : > { %p1261_p12 = pneg %p1260_p4  ;;  %p1267_p8 = por %p1266_p5, %p1265_p11 }
  0x31   : > { %p1268_p9 = pnand %p1267_p8, %p1261_p12 }
  0x33   : > { %1271 = shalt.err (!%p1268_p9)
}
  0x34   : > { %1168 = dma.hbm_to_vmem [thread:$0]  (!%p1539_p13), %s1535_s28, 64, %s1543_s14, %s311_s17  }
  0x35   : > { %p1785_p0 = scmp.lt.s32.totalorder %s1404_s12, 3  ;;  %p1786_p1 = scmp.ge.s32.totalorder %s1404_s12, 1 }
  0x36   : > { %s1074_s18 = sshll.u32 %s1404_s12, 4  ;;  %s339_s25 = scalar_lea.vmem [#allocation5], %s1528_s23 }
  0x37   : > { %p1577_p7 = pnand %p1786_p1, %p1785_p0  ;;  %s1585_s19 = scalar_lea.hbm %s1768_s3, %s1074_s18 }
  0x38   : > { %s346_s27 = sshll.u32 %s339_s25, 4  ;;  %s337_s28 = scalar_lea.sflag [#allocation6], %s1528_s23  ;;  %s347_s27 = int_to_ptr.vmem [resolvable:$true] %s346_s27 }
  0x39   : > { %s1787_s24 = scalar_select %p1577_p7, 1, 0 }
  0x3a   : > { %s1272_s14 = scalar_lea.hbm %s1585_s19, 16  ;;  %s1277_s26 = scalar_lea.hbm %s1768_s3, 32 }
  0x3b   : > { %p1273_p11 = scmp.ne.s32.totalorder %s1585_s19, %s1272_s14  ;;  %p1278_p2 = scmp.lt.u32.totalorder %s1585_s19, %s1768_s3 }
  0x3c   : > { %p1279_p4 = scmp.lt.u32.totalorder %s1277_s26, %s1272_s14  ;;  %p1281_p8 = scmp.lt.u32.totalorder %s1272_s14, %s1585_s19 }
  0x3d   : > { %p1275_p12 = pnand %p1273_p11, %p1244_p3 }
  0x3e   : > { %p1280_p5 = por %p1279_p4, %p1278_p2 }
  0x3f   : > { %p1276_p10 = pneg %p1275_p12 }
  0x40   : > { %p1282_p9 = por %p1281_p8, %p1280_p5 }
  0x42   : > { %p1283_p0 = pnand %p1282_p9, %p1276_p10 }
  0x44   : > { %1286 = shalt.err (!%p1283_p0)
}
  0x45   : > { %s1287_s23 = scalar_lea.vmem %s347_s27, 16  ;;  %s1407_s25 = smov [#allocation5]  }
  0x46   : > { %p1288_p1 = scmp.ne.s32.totalorder %s347_s27, %s1287_s23  ;;  %s1292_s1 = sshll.u32 %s1407_s25, 4  ;;  %s1293_s1 = int_to_ptr.vmem [resolvable:$false] %s1292_s1 }
  0x47   : > { %s1294_s17 = scalar_lea.vmem %s1293_s1, 32  ;;  %p1295_p6 = scmp.lt.s32.totalorder %s347_s27, %s1293_s1 }
  0x48   : > { %p1290_p11 = pnand %p1288_p1, %p1244_p3  ;;  %p1296_p7 = scmp.lt.s32.totalorder %s1294_s17, %s1287_s23 }
  0x4a   : > { %p1291_p12 = pneg %p1290_p11  ;;  %p1297_p2 = por %p1296_p7, %p1295_p6 }
  0x4c   : > { %p1298_p4 = pnand %p1297_p2, %p1291_p12 }
  0x4e   : > { %1301 = shalt.err (!%p1298_p4)
}
  0x4f   : > { %1171 = dma.hbm_to_vmem [thread:$0]  (!%p1539_p13), %s1585_s19, 16, %s347_s27, %s337_s28  }
  0x50   : > { %p1788_p10 = scmp.ne.s32.totalorder %s1787_s24, 0 }
  0x51   : > { %s1611_s14 = sand.u32 (!%p1788_p10), 1, %s1396_s10   ;;  %p1789_p3 = scmp.ne.s32.totalorder (!%p1788_p10), %s1780_s20, 0 }
  0x52   : > { %355 = sbr.rel (%p1788_p10) target bundleno = 1024 (0x400), region = 52  ;;  %s1076_s26 = sshll.u32 (!%p1788_p10), %s1611_s14, 2 }
  0x53   : > { %s358_s18 = scalar_lea.sflag (!%p1788_p10), [#allocation3], %s1611_s14  ;;  %s361_s29 = scalar_lea.vmem (!%p1788_p10), [#allocation2], %s1076_s26 }
  0x59   : > { %1375 = dma.done.wait (%p1789_p3), %s358_s18, 64  }
  0x5a   : > { %1377 = vsyncadd (%p1789_p3), %s358_s18, 4294967232  ;;  %s367_s16 = scalar_lea.sflag [#allocation6], %s1611_s14  ;;  %s369_s24 = scalar_lea.vmem [#allocation5], %s1611_s14 }
  0x5b   : > { %1379 = dma.done.wait (%p1789_p3), %s367_s16, 16  }
  0x5c   : > { %1381 = vsyncadd (%p1789_p3), %s367_s16, 4294967280  ;;  %p423_p6 = scmp.lt.s32.totalorder %s1490_s13, 1  ;;  %v1408_v0 = vmov 0.0   ;;  %vm1409_vm0 = vmmov 0   ;;  %v1410_v1 = vmov 0   ;;  %vm442_vm1 = vcmask 261120  }
  0x5d   : > { %1119 = vmatprep.subr.bf16.mxu0 %v1408_v0  ;;  %1121 = vmatprep.mubr.msk.bf16.mxu0 %vm1409_vm0, %v1408_v0  ;;  %v436_v2 = vld [vmem:[%s361_s29] sm:$0xf]  ;;  %v1225_v9 = vld [vmem:[%s1771_s6 + $0x8] sm:$0xff]   ;;  %vm642_vm2 = vcmask 64512   ;;  %vm670_vm3 = vcmask 1043456   ;;  %s1077_s1 = sshll.u32 %s1611_s14, 4 }
  0x5e   : > { %s424_s19 = scalar_select %p423_p6, %s1490_s13, 1  ;;  %1222 = vset.pattern.permute.xlu0 %v1410_v1  ;;  %1125 = vmatprep.subr.bf16.mxu1 %v1408_v0  ;;  %v447_v3 = vsel %vm442_vm1, %v436_v2, 0  ;;  %v1224_v7 = vld [vmem:[%s1771_s6] sm:$0xff]   ;;  %v1227_v10 = vld [vmem:[%s1769_s4 + $0x8] sm:$0xff]   ;;  %vm770_vm4 = vcmask 130048  }
  0x5f   : > { %1129 = vmatprep.mubr.msk.bf16.mxu1 %vm1409_vm0, %v1408_v0  ;;  %1120 = vmatpush3.bf16.xpose.msra.mxu0 %v447_v3  ;;  %v1226_v8 = vld [vmem:[%s1769_s4] sm:$0xff]   ;;  %v1411_v3 = vmov 0.0|0.0   ;;  %s1670_s18 = scalar_lea.vmem [#allocation7], %s1077_s1  ;;  %s1078_s16 = sshll.u32 %s1611_s14, 3 }
  0x60   : > { %s1103_s27 = sshll.u32 %s424_s19, 3  ;;  %s1104_s28 = sshll.u32 %s424_s19, 4  ;;  %1133 = vmatprep.subr.bf16.mxu0 %v1408_v0  ;;  %1126 = vmatpush3.bf16.msra.mxu1 %v1226_v8  ;;  %v1085_v16 = vld [vmem:[%s369_s24] ss:$0 sm:$0xff] }
  0x61   : > { %s432_s25 = scalar_lea.vmem %s1767_s2, %s1104_s28  ;;  %s427_s26 = scalar_lea.vmem %s1765_s0, %s1103_s27  ;;  %1127 = vmatprep.subr.bf16.mxu1 %v1408_v0  ;;  %v1090_v53 = vld [vmem:[%s1772_s7] ss:$0 sm:$0xff] }
  0x62   : > { %v492_v4 = vld [vmem:[%s432_s25] sm:$0xff]  ;;  %v493_v5 = vld [vmem:[%s432_s25 + $0x8] sm:$0xff]  ;;  %s1677_s19 = scalar_lea.vmem [#allocation8], %s1078_s16  ;;  %s1412_s27 = smov 32  }
  0x63   : > { %496 = vperm.xlu0 %1222, %v492_v4   ;;  %v1223_v6 = vld [vmem:[%s427_s26] sm:$0xff]   ;;  %s1413_s29 = smov 64   ;;  %s1100_s28 = sshll.u32 %s1490_s13, 7 }
  0x64   : > { %1128 = vmatpush3.bf16.msra.mxu1 %v1227_v10  ;;  %v1086_v63 = vld [vmem:[%s1770_s5] ss:$0 sm:$0xff]  ;;  %s923_s23 = sshll.u32 %s1677_s19, 4  ;;  %s1688_s25 = scalar_lea.hbm %s1774_s9, %s1100_s28  ;;  %s924_s23 = int_to_ptr.vmem [resolvable:$true] %s923_s23 }
  0x65   : > { %1141 = vmatprep.subr.bf16.mxu1 %v1408_v0  ;;  %s894_s1 = scalar_lea.sflag [#allocation9], %s1611_s14  ;;  %s1302_s17 = scalar_lea.vmem %s924_s23, 128 }
  0x66   : > { %1122 = vmatmul.mubr.msk.bf16.vlgmr.msra.gmra.mrb[0].mxu0 %vm442_vm1, %v1223_v6  ;;  %p1303_p13 = scmp.ne.s32.totalorder %s924_s23, %s1302_s17  ;;  %p1790_p7 = scmp.ne.s32.totalorder %s1781_s21, 0 }
  0x67   : > { %501 = vperm.xlu0 %1222, %v493_v5   ;;  %1137 = vmatprep.mubr.msk.bf16.mxu0 %vm1409_vm0, %v1408_v0  ;;  %s1414_s26 = smov [#allocation8]  }
  0x68   : > { %1134 = vmatpush3.bf16.msra.mxu0 %v1224_v7  ;;  %1130 = vmatmul.mubr.msk.bf16.vlgmr.msra.gmra.mrb[0].mxu1 %vm442_vm1, %v1223_v6  ;;  %p1304_p5 = pnand %p1303_p13, %p1790_p7  ;;  %s1306_s16 = sshll.u32 %s1414_s26, 4  ;;  %s1307_s16 = int_to_ptr.vmem [resolvable:$false] %s1306_s16 }
  0x69   : > { %1135 = vmatprep.subr.bf16.mxu0 %v1408_v0  ;;  %1143 = vmatprep.mubr.msk.bf16.mxu1 %vm1409_vm0, %v1408_v0  ;;  %p1309_p9 = scmp.lt.s32.totalorder %s924_s23, %s1307_s16 }
  0x6a   : > { %p1305_p8 = pneg %p1304_p5 }
  0x6c   : > { %1136 = vmatpush3.bf16.msra.mxu0 %v1225_v9 }
  0x6d   : > { %1154 = vmatprep.subr.bf16.mxu0 %v1411_v3 }
  0x6f   : > { %1138 = vmatmul.mubr.msk.bf16.vlgmr.msra.gmra.mrb[4].mxu0 %vm442_vm1, %v436_v2 }
  0x70   : > { %1151 = vmatprep.mubr.msk.f32.mxu0 %vm1409_vm0, %v1408_v0 }
  0xe2   : > { %v497_v11 = vpop.permute.xlu0 %496 }
  0xe6   : > { %v502_v20 = vpop.permute.xlu0 %501 }
 0x139   : > { %v483_v12 = vpop.f32.mrb[0].mxu0 }
 0x13a   : > { %v490_v13 = vmul.f32 0.17677669, %v483_v12  ;;  %v1123_v14 = vpop.f32.mrb[1].mxu0 }
 0x13b   : > { %v486_v15 = vpop.f32.mrb[2].mxu0  ;;  %v572_v0 = vpop.f32.mrb[0].mxu1 }
 0x13c   : > { %v504_v17 = vadd.f32 %v497_v11, %v490_v13  ;;  %v491_v18 = vmul.f32 0.17677669, %v486_v15  ;;  %v1124_v19 = vpop.f32.mrb[3].mxu0  ;;  %v573_v1 = vadd.f32 %v1086_v63, %v572_v0  ;;  %v1131_v2 = vpop.f32.mrb[1].mxu1 }
 0x13d   : > { %v575_v4 = vpop.f32.mrb[2].mxu1 }
 0x13e   : > { %v505_v21 = vadd.f32 %v502_v20, %v491_v18  ;;  %v513_v22 = vadd.f32 %v1085_v16, %v504_v17  ;;  %844 = vst.msk [vmem:[%s1670_s18] sm:$0xff] %vm442_vm1, %v573_v1  ;;  %v576_v6 = vadd.f32 %v1086_v63, %v575_v4  ;;  %v1132_v7 = vpop.f32.mrb[3].mxu1 }
 0x140   : > { %v643_v23 = vsel %vm642_vm2, %v513_v22, -inf  ;;  %v514_v24 = vadd.f32 %v1085_v16, %v505_v21  ;;  %v1155_v8 = vpack.c.bf16 %v576_v6, %v573_v1  ;;  %845 = vst.msk [vmem:[%s1670_s18 + $0x8] sm:$0xff] %vm442_vm1, %v576_v6 }
 0x141   : > { %644 = vmax.xlane.f32.xlu1 %v643_v23 }
 0x142   : > { %v646_v25 = vsel %vm642_vm2, %v514_v24, -inf  ;;  %v636_v54 = vpop.f32.mrb[4].mxu0  ;;  %1156 = vmatpush3.bf16.msra.mxu0 %v1155_v8 }
 0x143   : > { %v637_v55 = vadd.f32 %v1090_v53, %v636_v54  ;;  %v1139_v56 = vpop.f32.mrb[5].mxu0 }
 0x144   : > { %v639_v57 = vpop.f32.mrb[6].mxu0 }
 0x145   : > { %647 = vmax.xlane.f32.xlu1 %v646_v25  ;;  %v666_v59 = vpack.c.bf16 %v637_v55, %v637_v55  ;;  %v1140_v60 = vpop.f32.mrb[7].mxu0  ;;  %887 = vst.msk [vmem:[%s1677_s19] sm:$0xff] %vm442_vm1, %v637_v55 }
 0x147   : > { %v672_v61 = vsel %vm670_vm3, %v666_v59, 0 }
 0x148   : > { %1142 = vmatpush3.bf16.msra.mxu1 %v672_v61 }
 0x1ce   : > { %v645_v26 = vpop.xlane.xlu1 %644 }
 0x1cf   : > { %v649_v27 = vsub.f32 %v513_v22, %v645_v26 }
 0x1d1   : > { %v651_v28 = vmul.f32 1.442695, %v649_v27 }
 0x1d2   : > { %v648_v29 = vpop.xlane.xlu1 %647 }
 0x1d3   : > { %1228 = vpow2.f32 %v651_v28  ;;  %v650_v30 = vsub.f32 %v514_v24, %v648_v29  ;;  %v715_v31 = vmax.f32 %v645_v26, %v648_v29 }
 0x1d5   : > { %v653_v32 = vmul.f32 1.442695, %v650_v30  ;;  %v716_v33 = vrot.slane %v715_v31, 4 }
 0x1d7   : > { %1230 = vpow2.f32 %v653_v32  ;;  %v717_v34 = vmax.f32 %v715_v31, %v716_v33 }
 0x1d9   : > { %v718_v35 = vrot.slane %v717_v34, 2 }
 0x1db   : > { %v719_v36 = vmax.f32 %v717_v34, %v718_v35 }
 0x1dd   : > { %v1658_v37 = vpop.eup %1228  ;;  %v720_v38 = vrot.slane %v719_v36, 1 }
 0x1de   : > { %v655_v39 = vsel %vm642_vm2, %v1658_v37, 0.0 }
 0x1df   : > { %v721_v40 = vmax.f32 %v719_v36, %v720_v38  ;;  %656 = vadd.xlane.f32.xlu0 %v655_v39 }
 0x1e1   : > { %v1231_v41 = vpop.eup %1230  ;;  %v722_v42 = vsub.f32 %v645_v26, %v721_v40  ;;  %v723_v43 = vsub.f32 %v648_v29, %v721_v40  ;;  %v870_v26 = vlaneseq }
 0x1e2   : > { %v658_v44 = vsel %vm642_vm2, %v1231_v41, 0.0 }
 0x1e3   : > { %v724_v45 = vmul.f32 1.442695, %v722_v42  ;;  %v726_v46 = vmul.f32 1.442695, %v723_v43  ;;  %659 = vadd.xlane.f32.xlu1 %v658_v44  ;;  %v871_v27 = vshrl.u32 %v870_v26, 7 }
 0x1e5   : > { %1232 = vpow2.f32 %v724_v45  ;;  %v872_v28 = vsub.s32 0, %v871_v27 }
 0x1e6   : > { %1234 = vpow2.f32 %v726_v46 }
 0x1ef   : > { %v1233_v47 = vpop.eup %1232 }
 0x1f0   : > { %v1235_v48 = vpop.eup %1234 }
 0x1f1   : > { %v728_v49 = vadd.f32 %v1235_v48, %v1233_v47 }
 0x1f3   : > { %v729_v50 = vrot.slane %v728_v49, 4 }
 0x1f5   : > { %v730_v51 = vadd.f32 %v729_v50, %v728_v49 }
 0x1f7   : > { %v731_v52 = vrot.slane %v730_v51, 2 }
 0x1f9   : > { %v732_v58 = vadd.f32 %v731_v52, %v730_v51 }
 0x1fb   : > { %v733_v62 = vrot.slane %v732_v58, 1 }
 0x1fd   : > { %v734_v5 = vadd.f32 %v733_v62, %v732_v58 }
 0x1ff   : > { %1236 = vrcp.f32 %v734_v5 }
 0x209   : > { %v1237_v9 = vpop.eup %1236 }
 0x20a   : > { %v736_v10 = vmul.f32 %v1237_v9, %v1233_v47  ;;  %v737_v11 = vmul.f32 %v1237_v9, %v1235_v48 }
 0x216   : > { %738 = vxpose.xlu1.b32.start [1/2] (short) (narrow) %v736_v10, 8 }
 0x21a   : > { %739 = vxpose.xlu1.b32.end [2/2] (short) (narrow) %v737_v11, 8 }
 0x26c   : > { %v657_v12 = vpop.xlane.xlu0 %656 }
 0x26d   : > { %1238 = vrcp.f32 %v657_v12 }
 0x270   : > { %v660_v13 = vpop.xlane.xlu1 %659 }
 0x271   : > { %1240 = vrcp.f32 %v660_v13 }
 0x277   : > { %v1239_v14 = vpop.eup %1238 }
 0x278   : > { %v663_v16 = vmul.f32 %v1239_v14, %v1658_v37 }
 0x27b   : > { %v1241_v15 = vpop.eup %1240 }
 0x27c   : > { %v664_v17 = vmul.f32 %v1241_v15, %v1231_v41 }
 0x27e   : > { %v665_v18 = vpack.c.bf16 %v664_v17, %v663_v16 }
 0x280   : > { %1144 = vmatmul.mubr.msk.bf16.vlgmr.msra.gmra.mrb[4].mxu1 %vm642_vm2, %v665_v18 }
 0x296   : > { %v754_v19 = vpop.trf.xlu1 }
 0x297   : > { %1152 = vmatmul.mubr.msk.f32.vlgmr.msra.gmra.mrb[8].mxu0 %vm770_vm4, %v754_v19 }
 0x353   : > { %v708_v20 = vpop.f32.mrb[4].mxu1 }
 0x354   : > { %848 = vrot.lane.b32.xlu0 %v708_v20, %s1412_s27  ;;  %v1145_v21 = vpop.f32.mrb[5].mxu1  ;;  %v857_v25 = vmul.f32 %v708_v20, %v573_v1 }
 0x355   : > { %v711_v22 = vpop.f32.mrb[6].mxu1 }
 0x356   : > { %v858_v23 = vmul.f32 %v711_v22, %v576_v6  ;;  %v1146_v24 = vpop.f32.mrb[7].mxu1 }
 0x358   : > { %850 = vrot.lane.b32.xlu0 %v711_v22, %s1412_s27  ;;  %863 = vrot.lane.b32.xlu1 %v858_v23, %s1413_s29  ;;  %s1308_s27 = scalar_lea.vmem %s1307_s16, 256 }
 0x359   : > { %p1310_p0 = scmp.lt.s32.totalorder %s1308_s27, %s1302_s17 }
 0x35b   : > { %p1311_p1 = por %p1310_p0, %p1309_p9 }
 0x35c   : > { %861 = vrot.lane.b32.xlu0 %v857_v25, %s1413_s29 }
 0x35d   : > { %p1312_p11 = pnand %p1311_p1, %p1305_p8 }
 0x36a   : > { %v840_v29 = vpop.f32.mrb[8].mxu0 }
 0x36b   : > { %v873_v30 = vrot.slane %v840_v29, %v872_v28  ;;  %v1153_v31 = vpop.f32.mrb[9].mxu0 }
 0x36c   : > { %1315 = shalt.err (!%p1312_p11)
}
 0x36d   : > { %s1316_s19 = scalar_lea.hbm %s1688_s25, 128  ;;  %s1320_s20 = scalar_lea.hbm %s1774_s9, 256 }
 0x36e   : > { %p1317_p12 = scmp.ne.s32.totalorder %s1688_s25, %s1316_s19  ;;  %p1321_p10 = scmp.lt.u32.totalorder %s1688_s25, %s1774_s9 }
 0x36f   : > { %p1322_p3 = scmp.lt.u32.totalorder %s1320_s20, %s1316_s19  ;;  %p1324_p13 = scmp.lt.u32.totalorder %s1316_s19, %s1688_s25 }
 0x370   : > { %p1318_p2 = pnand %p1317_p12, %p1790_p7 }
 0x371   : > { %p1323_p6 = por %p1322_p3, %p1321_p10 }
 0x372   : > { %p1319_p4 = pneg %p1318_p2 }
 0x373   : > { %p1325_p5 = por %p1324_p13, %p1323_p6 }
 0x375   : > { %p1326_p8 = pnand %p1325_p5, %p1319_p4 }
 0x377   : > { %1329 = shalt.err (!%p1326_p8)
}
 0x378   : > { %1162 = dma.vmem_to_hbm [thread:$0]  (%p1790_p7), %s924_s23, 128, %s1688_s25, %s894_s1   ;;  %v874_v32 = vmul.f32 %v873_v30, %v708_v20  ;;  %v875_v33 = vmul.f32 %v873_v30, %v711_v22  ;;  %vm854_vm5 = vcmask 523520   ;;  %vm867_vm6 = vcmask 785920  }
 0x379   : > { %s1415_s17 = smov 96   ;;  %vm884_vm7 = vcmask 1048320   ;;  %s1105_s23 = sshll.u32 %s1490_s13, 8 }
 0x37a   : > { %878 = vrot.lane.b32.xlu0 %v874_v32, %s1415_s17  ;;  %s907_s25 = sshll.u32 %s1670_s18, 4  ;;  %s1718_s27 = scalar_lea.hbm %s1773_s8, %s1105_s23  ;;  %s1720_s25 = int_to_ptr.vmem [resolvable:$true] %s907_s25 }
 0x37b   : > { %s889_s19 = scalar_lea.sflag [#allocation4], %s1611_s14  ;;  %s1330_s29 = scalar_lea.vmem %s1720_s25, 256 }
 0x37c   : > { %p1331_p9 = scmp.ne.s32.totalorder %s1720_s25, %s1330_s29  ;;  %s1416_s13 = smov [#allocation7]  }
 0x37d   : > { %s1334_s28 = sshll.u32 %s1416_s13, 4  ;;  %s1335_s28 = int_to_ptr.vmem [resolvable:$false] %s1334_s28 }
 0x37e   : > { %880 = vrot.lane.b32.xlu0 %v875_v33, %s1415_s17  ;;  %p1332_p0 = pnand %p1331_p9, %p1790_p7  ;;  %s1336_s20 = scalar_lea.vmem %s1335_s28, 512 }
 0x37f   : > { %p1337_p11 = scmp.lt.s32.totalorder %s1720_s25, %s1335_s28  ;;  %p1338_p12 = scmp.lt.s32.totalorder %s1336_s20, %s1330_s29 }
 0x380   : > { %p1333_p1 = pneg %p1332_p0 }
 0x381   : > { %p1339_p2 = por %p1338_p12, %p1337_p11 }
 0x383   : > { %p1340_p4 = pnand %p1339_p2, %p1333_p1 }
 0x3c6   : > { %v849_v34 = vpop.permute.xlu0 %848 }
 0x3c7   : > { %855 = vst.msk [vmem:[%s1670_s18] sm:$0xff] %vm854_vm5, %v849_v34 }
 0x3ca   : > { %v851_v35 = vpop.permute.xlu0 %850  ;;  %v864_v36 = vpop.permute.xlu1 %863 }
 0x3cb   : > { %856 = vst.msk [vmem:[%s1670_s18 + $0x8] sm:$0xff] %vm854_vm5, %v851_v35 }
 0x3cc   : > { %869 = vst.msk [vmem:[%s1670_s18 + $0x8] sm:$0xff] %vm867_vm6, %v864_v36 }
 0x3ce   : > { %v862_v37 = vpop.permute.xlu0 %861 }
 0x3cf   : > { %868 = vst.msk [vmem:[%s1670_s18] sm:$0xff] %vm867_vm6, %v862_v37 }
 0x3ec   : > { %v879_v38 = vpop.permute.xlu0 %878 }
 0x3ed   : > { %885 = vst.msk [vmem:[%s1670_s18] sm:$0xff] %vm884_vm7, %v879_v38 }
 0x3f0   : > { %v881_v39 = vpop.permute.xlu0 %880 }
 0x3f1   : > { %886 = vst.msk [vmem:[%s1670_s18 + $0x8] sm:$0xff] %vm884_vm7, %v881_v39 }
 0x3f2   : > { %1343 = shalt.err (!%p1340_p4)
}
 0x3f3   : > { %s1344_s18 = scalar_lea.hbm %s1718_s27, 256  ;;  %s1348_s17 = scalar_lea.hbm %s1773_s8, 512 }
 0x3f4   : > { %p1345_p10 = scmp.ne.s32.totalorder %s1718_s27, %s1344_s18  ;;  %p1349_p13 = scmp.lt.u32.totalorder %s1718_s27, %s1773_s8 }
 0x3f5   : > { %p1350_p5 = scmp.lt.u32.totalorder %s1348_s17, %s1344_s18  ;;  %p1352_p9 = scmp.lt.u32.totalorder %s1344_s18, %s1718_s27 }
 0x3f6   : > { %p1346_p3 = pnand %p1345_p10, %p1790_p7 }
 0x3f7   : > { %p1351_p8 = por %p1350_p5, %p1349_p13 }
 0x3f8   : > { %p1347_p6 = pneg %p1346_p3 }
 0x3f9   : > { %p1353_p0 = por %p1352_p9, %p1351_p8 }
 0x3fb   : > { %p1354_p1 = pnand %p1353_p0, %p1347_p6 }
 0x3fd   : > { %1357 = shalt.err (!%p1354_p1)
}
 0x3fe   : > { %s1417_s16 = smov 128   ;;  %s1418_s29 = smov 8  }
 0x3ff   : > { %1161 = dma.vmem_to_hbm [thread:$0]  (%p1790_p7), %s1720_s25, 256, %s1718_s27, %s889_s19, %s1417_s16, %s1417_s16, %s1418_s29  }
 0x400 PF: > { %s935_s13 = sand.u32 1, %s1392_s30   ;;  %p1791_p11 = scmp.ne.s32.totalorder %s1782_s22, 0 }
 0x401   : > { %p1792_p12 = scmp.ge.s32.totalorder %s1404_s12, 2  ;;  %s936_s28 = scalar_lea.sflag [#allocation4], %s935_s13 }
 0x403   : > { %p1173_p2 = pnand %p1792_p12, %p1791_p11 }
 0x405   : > { %1383 = dma.done.wait (!%p1173_p2), %s936_s28, 256  }
 0x406   : > { %1385 = vsyncadd (!%p1173_p2), %s936_s28, 4294967040  ;;  %s945_s20 = scalar_lea.sflag [#allocation9], %s935_s13 }
 0x407   : > { %1387 = dma.done.wait (!%p1173_p2), %s945_s20, 128  }
 0x408   : > { %1389 = vsyncadd (!%p1173_p2), %s945_s20, 4294967168  ;;  %s1793_s21 = sld [smem:[#allocation14_spill]]  ;;  %p29_p7 = scmp.ge.s32.totalorder %s1494_s15, 4  }
 0x409   : > { %s1794_s30 = smov %s1396_s10  ;;  %s1795_s10 = smov %s1400_s11 }
 0x40a   : > { %s1797_s12 = smov %s1494_s15  ;;  %31 = sbr.rel (!%p29_p7) target bundleno = 11 (0xb), region = 133 }
 0x40e   : > { %s1796_s11 = smov %s1793_s21 }
 0x411   :  { %950 = vsyncpa [#allocation3], 1 }
 0x412   :  { %952 = vsyncpa [#allocation3 + $0x1], 1 }
 0x413   :  { %953 = vsyncpa [#allocation6], 1 }
 0x414   :  { %955 = vsyncpa [#allocation6 + $0x1], 1 }
 0x415   :  { %956 = vsyncpa [#allocation4], 1 }
 0x416   :  { %958 = vsyncpa [#allocation4 + $0x1], 1 }
 0x417   :  { %959 = vsyncpa [#allocation9], 1 }
 0x418   :  { %961 = vsyncpa [#allocation9 + $0x1], 1 }

</bundles_post_ra>
